<compile_context>
chip_gen: v6e
topology: v6e:2x2x1
jax: 0.10.0
libtpu: 0.0.40
codegen_flags: <defaults>
</compile_context>

<pallas_src>
import jax
import jax.numpy as jnp
import numpy as np
from jax.experimental import pallas as pl
from jax.experimental.pallas import tpu as pltpu


# ----------------------------- helpers -------------------------------------- #
def _rup(n, m):
    return ((n + m - 1) // m) * m


# ----------------------------- Pallas kernel ------------------------------- #
def _diphone_kernel(
    x_ref, ctx_ref,
    emb_tbl_ref, w0_ref, lb0_ref, cb0_ref, cw0e_ref,
    lw1_ref, lb1_ref, lwo_ref, lbo_ref,
    cw1_ref, cb1_ref, cwo_ref, cbo_ref,
    logits_c_ref, logits_l_ref, emb_out_ref,
):
    x = x_ref[...]                       # (TM, F)  bf16
    ctx = ctx_ref[...]                   # (TM, 1)  int32 (contiguous column in HBM)
    tm = x.shape[0]
    h_pad = lb0_ref.shape[1]             # padded hidden (multiple of 128)
    c_pad = emb_tbl_ref.shape[0]         # padded context count (multiple of 128)

    # ---- fused first layer: both encoders share x -> one MXU call (K=F, N=2*H_pad) ----
    z0 = jnp.dot(x, w0_ref[...], preferred_element_type=jnp.float32)   # (TM, 2*H_pad) f32

    # ---- left context encoder: Linear -> ReLU -> Linear -> ReLU -> Linear ----
    hl = jnp.maximum(z0[:, :h_pad] + lb0_ref[...], 0.0).astype(jnp.bfloat16)
    hl = jnp.maximum(
        jnp.dot(hl, lw1_ref[...], preferred_element_type=jnp.float32) + lb1_ref[...],
        0.0).astype(jnp.bfloat16)
    logits_l_ref[...] = (
        jnp.dot(hl, lwo_ref[...], preferred_element_type=jnp.float32) + lbo_ref[...])

    # ---- embedding lookup as one-hot matmul (exact row selection, kept in f32) ----
    onehot = (ctx == jax.lax.broadcasted_iota(jnp.int32, (tm, c_pad), 1)
              ).astype(jnp.float32)                                     # (TM, C_pad)
    emb = jnp.dot(onehot, emb_tbl_ref[...],
                  preferred_element_type=jnp.float32)                   # (TM, E_pad)
    emb_out_ref[...] = emb

    # ---- center encoder on concat(features, emb): concat folded into split matmul ----
    hc = jnp.maximum(
        z0[:, h_pad:]
        + jnp.dot(emb.astype(jnp.bfloat16), cw0e_ref[...],
                  preferred_element_type=jnp.float32)
        + cb0_ref[...], 0.0).astype(jnp.bfloat16)
    hc = jnp.maximum(
        jnp.dot(hc, cw1_ref[...], preferred_element_type=jnp.float32) + cb1_ref[...],
        0.0).astype(jnp.bfloat16)
    logits_c_ref[...] = (
        jnp.dot(hc, cwo_ref[...], preferred_element_type=jnp.float32) + cbo_ref[...])


# ------------------------------- Wrapper ------------------------------------ #
def factored_diphone_forward(features, contexts_left, params, *, tile_rows=None):
    """features: (B, T, F) float32, contexts_left: (B, T) int32."""
    LANE = 128
    B, T, F = features.shape
    N = B * T

    (emb_tbl,
     lw0, lb0, lw1, lb1, lwo, lbo,
     cw0, cb0, cw1, cb1, cwo, cbo) = params

    num_contexts, emb_dim = emb_tbl.shape
    hidden = lw0.shape[1]
    num_center = cwo.shape[1]

    # ---- padded (lane-dense) dims: every matmul N/K and every output last dim is 128-aligned ----
    H = _rup(hidden, LANE)
    C = _rup(num_contexts, LANE)
    E = _rup(emb_dim, LANE)
    NC = _rup(num_center, LANE)

    # ---- row tile: big (MXU-friendly) but keep >=2 grid steps when possible (v7x has 2 TCs) ----
    if tile_rows is None:
        tile_rows = 512
    tile_rows = min(tile_rows, max(8, _rup((N + 1) // 2, 8)))
    tile_rows = _rup(tile_rows, 8)
    N_pad = _rup(N, tile_rows)
    grid = (pl.cdiv(N_pad, tile_rows),)

    # ---- inputs: pad rows (tail handling), bf16 features for the MXU ----
    x = features.reshape(N, F).astype(jnp.float32)
    ctx = contexts_left.reshape(N, 1).astype(jnp.int32)
    if N_pad != N:
        x = jnp.pad(x, ((0, N_pad - N), (0, 0)))
        ctx = jnp.pad(ctx, ((0, N_pad - N), (0, 0)))   # pads with index 0; rows sliced off below
    x = x.astype(jnp.bfloat16)

    f32 = lambda a: a.astype(jnp.float32)
    bf16 = lambda a: a.astype(jnp.bfloat16)

    # embedding table: pad rows to C (aligned one-hot K) and cols to E (lane-dense emb output)
    emb_tbl_p = jnp.pad(f32(emb_tbl), ((0, C - num_contexts), (0, E - emb_dim)))

    # left-context encoder weights (hidden padded to H, output padded to C; pads are zero)
    lw0_p = jnp.pad(f32(lw0), ((0, 0), (0, H - hidden)))
    lb0_p = jnp.pad(f32(lb0), ((0, 0), (0, H - hidden)))
    lw1_p = jnp.pad(f32(lw1), ((0, H - hidden), (0, H - hidden)))
    lb1_p = jnp.pad(f32(lb1), ((0, 0), (0, H - hidden)))
    lwo_p = jnp.pad(f32(lwo), ((0, H - hidden), (0, C - num_contexts)))
    lbo_p = jnp.pad(f32(lbo), ((0, 0), (0, C - num_contexts)))

    # center encoder: split first weight into feature part and embedding part (folds the concat)
    cw0f_p = jnp.pad(f32(cw0[:F, :]), ((0, 0), (0, H - hidden)))
    cw0e_p = jnp.pad(f32(cw0[F:, :]), ((0, E - emb_dim), (0, H - hidden)))
    cb0_p = jnp.pad(f32(cb0), ((0, 0), (0, H - hidden)))
    cw1_p = jnp.pad(f32(cw1), ((0, H - hidden), (0, H - hidden)))
    cb1_p = jnp.pad(f32(cb1), ((0, 0), (0, H - hidden)))
    cwo_p = jnp.pad(f32(cwo), ((0, H - hidden), (0, NC - num_center)))
    cbo_p = jnp.pad(f32(cbo), ((0, 0), (0, NC - num_center)))

    # fuse the two first-layer matmuls that share x: x @ [lw0 | cw0_feat]  -> (F, 2*H)
    w0_fused = bf16(jnp.concatenate([lw0_p, cw0f_p], axis=1))

    weights = (emb_tbl_p, w0_fused, lb0_p, cb0_p, bf16(cw0e_p),
               bf16(lw1_p), lb1_p, bf16(lwo_p), lbo_p,
               bf16(cw1_p), cb1_p, bf16(cwo_p), cbo_p)

    full = lambda a: pl.BlockSpec(a.shape, lambda i: (0,) * a.ndim)
    row_tile = lambda cols: pl.BlockSpec((tile_rows, cols), lambda i: (i, 0))

    out_shape = (
        jax.ShapeDtypeStruct((N_pad, NC), jnp.float32),
        jax.ShapeDtypeStruct((N_pad, C), jnp.float32),
        jax.ShapeDtypeStruct((N_pad, E), jnp.float32),
    )

    fn = pl.pallas_call(
        _diphone_kernel,
        grid=grid,
        in_specs=[row_tile(F), row_tile(1)] + [full(w) for w in weights],
        out_specs=[row_tile(NC), row_tile(C), row_tile(E)],
        out_shape=out_shape,
        compiler_params=pltpu.CompilerParams(
            dimension_semantics=("parallel",),
            # headroom under the 64 MiB v7x VMEM (fits 128 MiB v5e/v6e trivially)
            vmem_limit_bytes=48 * 1024 * 1024,
        ),
    )

    logits_c, logits_l, emb = fn(x, ctx, *weights)
    # slice off row tail + lane padding, reshape back to (B, T, ...)
    logits_c = logits_c[:N, :num_center].reshape(B, T, num_center)
    logits_l = logits_l[:N, :num_contexts].reshape(B, T, num_contexts)
    emb = emb[:N, :emb_dim].reshape(B, T, emb_dim)
    return logits_c, logits_l, emb


# --------------------------- Reference (pure JAX, f32) ----------------------- #
def reference_forward(features, contexts_left, params):
    (emb_tbl,
     lw0, lb0, lw1, lb1, lwo, lbo,
     cw0, cb0, cw1, cb1, cwo, cbo) = params
    x = features.astype(jnp.float32)
    h = jax.nn.relu(x @ lw0 + lb0)
    h = jax.nn.relu(h @ lw1 + lb1)
    logits_l = h @ lwo + lbo
    emb = jnp.take(emb_tbl, contexts_left, axis=0)
    xc = jnp.concatenate([x, emb], axis=-1)
    h = jax.nn.relu(xc @ cw0 + cb0)
    h = jax.nn.relu(h @ cw1 + cb1)
    logits_c = h @ cwo + cbo
    return logits_c, logits_l, emb


# ----------------------------- Param init ----------------------------------- #
def _init_linear(key, fan_in, fan_out):
    # matches torch.nn.Linear default: U(-1/sqrt(fan_in), 1/sqrt(fan_in))
    k1, k2 = jax.random.split(key)
    bound = 1.0 / np.sqrt(fan_in)
    w = jax.random.uniform(k1, (fan_in, fan_out), jnp.float32, -bound, bound)
    b = jax.random.uniform(k2, (1, fan_out), jnp.float32, -bound, bound)
    return w, b


def make_params(key, *, num_inputs, hidden, num_contexts, emb_dim, num_center):
    keys = jax.random.split(key, 8)
    emb_tbl = jax.random.normal(keys[0], (num_contexts, emb_dim), jnp.float32)
    lw0, lb0 = _init_linear(keys[1], num_inputs, hidden)
    lw1, lb1 = _init_linear(keys[2], hidden, hidden)
    lwo, lbo = _init_linear(keys[3], hidden, num_contexts)
    cw0, cb0 = _init_linear(keys[4], num_inputs + emb_dim, hidden)
    cw1, cb1 = _init_linear(keys[5], hidden, hidden)
    cwo, cbo = _init_linear(keys[6], hidden, num_center)
    return (emb_tbl, lw0, lb0, lw1, lb1, lwo, lbo, cw0, cb0, cw1, cb1, cwo, cbo)


# --------------------------------- Main -------------------------------------- #
if __name__ == "__main__":
    # config (small, deterministic). N = B*T = 512 -> two 256-row tiles (keeps both
    # v7x TensorCores busy while still feeding the MXU with large M tiles).
    B, T = 4, 128
    num_inputs = 32                  # F (encoder output dim)
    context_mix_mlp_dim = 64         # H
    num_contexts = 40                # C
    left_context_embedding_dim = 32  # E
    num_hmm_states_per_phone = 3
    num_center = num_contexts * num_hmm_states_per_phone  # boundary_class factor = 1

    key = jax.random.PRNGKey(0)
    k_feat, k_ctx, k_par = jax.random.split(key, 3)

    features = jax.random.normal(k_feat, (B, T, num_inputs), jnp.float32)
    contexts_left = jax.random.randint(k_ctx, (B, T), 0, num_contexts, dtype=jnp.int32)
    params = make_params(
        k_par,
        num_inputs=num_inputs,
        hidden=context_mix_mlp_dim,
        num_contexts=num_contexts,
        emb_dim=left_context_embedding_dim,
        num_center=num_center,
    )

    logits_c, logits_l, emb = factored_diphone_forward(features, contexts_left, params)
    jax.block_until_ready((logits_c, logits_l, emb))

    ref_c, ref_l, ref_e = reference_forward(features, contexts_left, params)

    # embedding gather is done in f32 (one-hot row selection) -> exact vs. reference
    np.testing.assert_allclose(np.asarray(emb), np.asarray(ref_e), rtol=1e-5, atol=1e-5)
    # logit paths run the MXU in bf16 with f32 accumulation -> loosened tolerance
    np.testing.assert_allclose(np.asarray(logits_l), np.asarray(ref_l), rtol=5e-2, atol=5e-2)
    np.testing.assert_allclose(np.asarray(logits_c), np.asarray(ref_c), rtol=5e-2, atol=5e-2)

    assert logits_c.shape == (B, T, num_center)
    assert logits_l.shape == (B, T, num_contexts)
    assert emb.shape == (B, T, left_context_embedding_dim)

    print("KERNEL_OK")
</pallas_src>

<mosaic_0001>
module attributes {stable_mosaic.version = 11 : i64} {
  func.func @_diphone_kernel(%arg0: i32, %arg1: memref<256x32xbf16, #tpu.memory_space<vmem>>, %arg2: memref<256x1xi32, #tpu.memory_space<vmem>>, %arg3: memref<128x128xf32, #tpu.memory_space<vmem>>, %arg4: memref<32x256xbf16, #tpu.memory_space<vmem>>, %arg5: memref<1x128xf32, #tpu.memory_space<vmem>>, %arg6: memref<1x128xf32, #tpu.memory_space<vmem>>, %arg7: memref<128x128xbf16, #tpu.memory_space<vmem>>, %arg8: memref<128x128xbf16, #tpu.memory_space<vmem>>, %arg9: memref<1x128xf32, #tpu.memory_space<vmem>>, %arg10: memref<128x128xbf16, #tpu.memory_space<vmem>>, %arg11: memref<1x128xf32, #tpu.memory_space<vmem>>, %arg12: memref<128x128xbf16, #tpu.memory_space<vmem>>, %arg13: memref<1x128xf32, #tpu.memory_space<vmem>>, %arg14: memref<128x128xbf16, #tpu.memory_space<vmem>>, %arg15: memref<1x128xf32, #tpu.memory_space<vmem>>, %arg16: memref<256x128xf32, #tpu.memory_space<vmem>>, %arg17: memref<256x128xf32, #tpu.memory_space<vmem>>, %arg18: memref<256x128xf32, #tpu.memory_space<vmem>>) attributes {dimension_semantics = [#tpu.dimension_semantics<parallel>], iteration_bounds = array<i64: 2>, scalar_prefetch = 0 : i64, scratch_operands = 0 : i64, tpu.core_type = #tpu.core_type<tc>, window_params = [{transform_indices = @transform_0, window_bounds = array<i64: 256, 32>}, {transform_indices = @transform_1, window_bounds = array<i64: 256, 1>}, {pipeline_mode = #tpu.pipeline_mode<synchronous>, transform_indices = @transform_2, window_bounds = array<i64: 128, 128>}, {pipeline_mode = #tpu.pipeline_mode<synchronous>, transform_indices = @transform_3, window_bounds = array<i64: 32, 256>}, {pipeline_mode = #tpu.pipeline_mode<synchronous>, transform_indices = @transform_4, window_bounds = array<i64: 1, 128>}, {pipeline_mode = #tpu.pipeline_mode<synchronous>, transform_indices = @transform_5, window_bounds = array<i64: 1, 128>}, {pipeline_mode = #tpu.pipeline_mode<synchronous>, transform_indices = @transform_6, window_bounds = array<i64: 128, 128>}, {pipeline_mode = #tpu.pipeline_mode<synchronous>, transform_indices = @transform_7, window_bounds = array<i64: 128, 128>}, {pipeline_mode = #tpu.pipeline_mode<synchronous>, transform_indices = @transform_8, window_bounds = array<i64: 1, 128>}, {pipeline_mode = #tpu.pipeline_mode<synchronous>, transform_indices = @transform_9, window_bounds = array<i64: 128, 128>}, {pipeline_mode = #tpu.pipeline_mode<synchronous>, transform_indices = @transform_10, window_bounds = array<i64: 1, 128>}, {pipeline_mode = #tpu.pipeline_mode<synchronous>, transform_indices = @transform_11, window_bounds = array<i64: 128, 128>}, {pipeline_mode = #tpu.pipeline_mode<synchronous>, transform_indices = @transform_12, window_bounds = array<i64: 1, 128>}, {pipeline_mode = #tpu.pipeline_mode<synchronous>, transform_indices = @transform_13, window_bounds = array<i64: 128, 128>}, {pipeline_mode = #tpu.pipeline_mode<synchronous>, transform_indices = @transform_14, window_bounds = array<i64: 1, 128>}, {transform_indices = @transform_15, window_bounds = array<i64: 256, 128>}, {transform_indices = @transform_16, window_bounds = array<i64: 256, 128>}, {transform_indices = @transform_17, window_bounds = array<i64: 256, 128>}]} {
    %c0 = arith.constant 0 : index
    %c0_0 = arith.constant 0 : index
    %0 = vector.load %arg1[%c0, %c0_0] : memref<256x32xbf16, #tpu.memory_space<vmem>>, vector<256x32xbf16>
    %c0_1 = arith.constant 0 : index
    %c0_2 = arith.constant 0 : index
    %1 = vector.load %arg2[%c0_1, %c0_2] : memref<256x1xi32, #tpu.memory_space<vmem>>, vector<256x1xi32>
    %c0_3 = arith.constant 0 : index
    %c0_4 = arith.constant 0 : index
    %2 = vector.load %arg4[%c0_3, %c0_4] : memref<32x256xbf16, #tpu.memory_space<vmem>>, vector<32x256xbf16>
    %cst = arith.constant dense<0.000000e+00> : vector<256x256xf32>
    %3 = tpu.matmul %0, %2, %cst {dimension_numbers = #tpu.dot_dimension_numbers<[1], [0], [0], [1], [0, 0, 1, 1], [], []>} : vector<256x32xbf16>, vector<32x256xbf16>, vector<256x256xf32> -> vector<256x256xf32>
    %4 = vector.extract_strided_slice %3 {offsets = [0, 0], sizes = [256, 128], strides = [1, 1]} : vector<256x256xf32> to vector<256x128xf32>
    %c0_5 = arith.constant 0 : index
    %c0_6 = arith.constant 0 : index
    %5 = vector.load %arg5[%c0_5, %c0_6] : memref<1x128xf32, #tpu.memory_space<vmem>>, vector<1x128xf32>
    %6 = vector.broadcast %5 : vector<1x128xf32> to vector<256x128xf32>
    %7 = arith.addf %4, %6 : vector<256x128xf32>
    %cst_7 = arith.constant 0.000000e+00 : f32
    %8 = vector.broadcast %cst_7 : f32 to vector<256x128xf32>
    %9 = arith.maximumf %7, %8 : vector<256x128xf32>
    %10 = arith.truncf %9 : vector<256x128xf32> to vector<256x128xbf16>
    %c0_8 = arith.constant 0 : index
    %c0_9 = arith.constant 0 : index
    %11 = vector.load %arg8[%c0_8, %c0_9] : memref<128x128xbf16, #tpu.memory_space<vmem>>, vector<128x128xbf16>
    %cst_10 = arith.constant dense<0.000000e+00> : vector<256x128xf32>
    %12 = tpu.matmul %10, %11, %cst_10 {dimension_numbers = #tpu.dot_dimension_numbers<[1], [0], [0], [1], [0, 0, 1, 1], [], []>} : vector<256x128xbf16>, vector<128x128xbf16>, vector<256x128xf32> -> vector<256x128xf32>
    %c0_11 = arith.constant 0 : index
    %c0_12 = arith.constant 0 : index
    %13 = vector.load %arg9[%c0_11, %c0_12] : memref<1x128xf32, #tpu.memory_space<vmem>>, vector<1x128xf32>
    %14 = vector.broadcast %13 : vector<1x128xf32> to vector<256x128xf32>
    %15 = arith.addf %12, %14 : vector<256x128xf32>
    %cst_13 = arith.constant 0.000000e+00 : f32
    %16 = vector.broadcast %cst_13 : f32 to vector<256x128xf32>
    %17 = arith.maximumf %15, %16 : vector<256x128xf32>
    %18 = arith.truncf %17 : vector<256x128xf32> to vector<256x128xbf16>
    %c0_14 = arith.constant 0 : index
    %c0_15 = arith.constant 0 : index
    %19 = vector.load %arg10[%c0_14, %c0_15] : memref<128x128xbf16, #tpu.memory_space<vmem>>, vector<128x128xbf16>
    %cst_16 = arith.constant dense<0.000000e+00> : vector<256x128xf32>
    %20 = tpu.matmul %18, %19, %cst_16 {dimension_numbers = #tpu.dot_dimension_numbers<[1], [0], [0], [1], [0, 0, 1, 1], [], []>} : vector<256x128xbf16>, vector<128x128xbf16>, vector<256x128xf32> -> vector<256x128xf32>
    %c0_17 = arith.constant 0 : index
    %c0_18 = arith.constant 0 : index
    %21 = vector.load %arg11[%c0_17, %c0_18] : memref<1x128xf32, #tpu.memory_space<vmem>>, vector<1x128xf32>
    %22 = vector.broadcast %21 : vector<1x128xf32> to vector<256x128xf32>
    %23 = arith.addf %20, %22 : vector<256x128xf32>
    %c0_19 = arith.constant 0 : index
    %c0_20 = arith.constant 0 : index
    %24 = vector.load %arg17[%c0_19, %c0_20] : memref<256x128xf32, #tpu.memory_space<vmem>>, vector<256x128xf32>
    tpu.vector_store %arg17[%c0_19, %c0_20], %23 {strides = array<i32>} : memref<256x128xf32, #tpu.memory_space<vmem>>, vector<256x128xf32>,
    %25 = tpu.iota {dimensions = array<i32: 1>} : vector<256x128xi32>
    %26 = vector.broadcast %1 : vector<256x1xi32> to vector<256x128xi32>
    %27 = arith.cmpi eq, %26, %25 : vector<256x128xi32>
    %28 = arith.extui %27 : vector<256x128xi1> to vector<256x128xi32>
    %29 = arith.sitofp %28 : vector<256x128xi32> to vector<256x128xf32>
    %c0_21 = arith.constant 0 : index
    %c0_22 = arith.constant 0 : index
    %30 = vector.load %arg3[%c0_21, %c0_22] : memref<128x128xf32, #tpu.memory_space<vmem>>, vector<128x128xf32>
    %cst_23 = arith.constant dense<0.000000e+00> : vector<256x128xf32>
    %31 = tpu.matmul %29, %30, %cst_23 {dimension_numbers = #tpu.dot_dimension_numbers<[1], [0], [0], [1], [0, 0, 1, 1], [], []>} : vector<256x128xf32>, vector<128x128xf32>, vector<256x128xf32> -> vector<256x128xf32>
    %c0_24 = arith.constant 0 : index
    %c0_25 = arith.constant 0 : index
    %32 = vector.load %arg18[%c0_24, %c0_25] : memref<256x128xf32, #tpu.memory_space<vmem>>, vector<256x128xf32>
    tpu.vector_store %arg18[%c0_24, %c0_25], %31 {strides = array<i32>} : memref<256x128xf32, #tpu.memory_space<vmem>>, vector<256x128xf32>,
    %33 = vector.extract_strided_slice %3 {offsets = [0, 128], sizes = [256, 128], strides = [1, 1]} : vector<256x256xf32> to vector<256x128xf32>
    %34 = arith.truncf %31 : vector<256x128xf32> to vector<256x128xbf16>
    %c0_26 = arith.constant 0 : index
    %c0_27 = arith.constant 0 : index
    %35 = vector.load %arg7[%c0_26, %c0_27] : memref<128x128xbf16, #tpu.memory_space<vmem>>, vector<128x128xbf16>
    %cst_28 = arith.constant dense<0.000000e+00> : vector<256x128xf32>
    %36 = tpu.matmul %34, %35, %cst_28 {dimension_numbers = #tpu.dot_dimension_numbers<[1], [0], [0], [1], [0, 0, 1, 1], [], []>} : vector<256x128xbf16>, vector<128x128xbf16>, vector<256x128xf32> -> vector<256x128xf32>
    %37 = arith.addf %33, %36 : vector<256x128xf32>
    %c0_29 = arith.constant 0 : index
    %c0_30 = arith.constant 0 : index
    %38 = vector.load %arg6[%c0_29, %c0_30] : memref<1x128xf32, #tpu.memory_space<vmem>>, vector<1x128xf32>
    %39 = vector.broadcast %38 : vector<1x128xf32> to vector<256x128xf32>
    %40 = arith.addf %37, %39 : vector<256x128xf32>
    %cst_31 = arith.constant 0.000000e+00 : f32
    %41 = vector.broadcast %cst_31 : f32 to vector<256x128xf32>
    %42 = arith.maximumf %40, %41 : vector<256x128xf32>
    %43 = arith.truncf %42 : vector<256x128xf32> to vector<256x128xbf16>
    %c0_32 = arith.constant 0 : index
    %c0_33 = arith.constant 0 : index
    %44 = vector.load %arg12[%c0_32, %c0_33] : memref<128x128xbf16, #tpu.memory_space<vmem>>, vector<128x128xbf16>
    %cst_34 = arith.constant dense<0.000000e+00> : vector<256x128xf32>
    %45 = tpu.matmul %43, %44, %cst_34 {dimension_numbers = #tpu.dot_dimension_numbers<[1], [0], [0], [1], [0, 0, 1, 1], [], []>} : vector<256x128xbf16>, vector<128x128xbf16>, vector<256x128xf32> -> vector<256x128xf32>
    %c0_35 = arith.constant 0 : index
    %c0_36 = arith.constant 0 : index
    %46 = vector.load %arg13[%c0_35, %c0_36] : memref<1x128xf32, #tpu.memory_space<vmem>>, vector<1x128xf32>
    %47 = vector.broadcast %46 : vector<1x128xf32> to vector<256x128xf32>
    %48 = arith.addf %45, %47 : vector<256x128xf32>
    %cst_37 = arith.constant 0.000000e+00 : f32
    %49 = vector.broadcast %cst_37 : f32 to vector<256x128xf32>
    %50 = arith.maximumf %48, %49 : vector<256x128xf32>
    %51 = arith.truncf %50 : vector<256x128xf32> to vector<256x128xbf16>
    %c0_38 = arith.constant 0 : index
    %c0_39 = arith.constant 0 : index
    %52 = vector.load %arg14[%c0_38, %c0_39] : memref<128x128xbf16, #tpu.memory_space<vmem>>, vector<128x128xbf16>
    %cst_40 = arith.constant dense<0.000000e+00> : vector<256x128xf32>
    %53 = tpu.matmul %51, %52, %cst_40 {dimension_numbers = #tpu.dot_dimension_numbers<[1], [0], [0], [1], [0, 0, 1, 1], [], []>} : vector<256x128xbf16>, vector<128x128xbf16>, vector<256x128xf32> -> vector<256x128xf32>
    %c0_41 = arith.constant 0 : index
    %c0_42 = arith.constant 0 : index
    %54 = vector.load %arg15[%c0_41, %c0_42] : memref<1x128xf32, #tpu.memory_space<vmem>>, vector<1x128xf32>
    %55 = vector.broadcast %54 : vector<1x128xf32> to vector<256x128xf32>
    %56 = arith.addf %53, %55 : vector<256x128xf32>
    %c0_43 = arith.constant 0 : index
    %c0_44 = arith.constant 0 : index
    %57 = vector.load %arg16[%c0_43, %c0_44] : memref<256x128xf32, #tpu.memory_space<vmem>>, vector<256x128xf32>
    tpu.vector_store %arg16[%c0_43, %c0_44], %56 {strides = array<i32>} : memref<256x128xf32, #tpu.memory_space<vmem>>, vector<256x128xf32>,
    return
  }
  func.func @transform_0(%arg0: i32) -> (i32, i32) {
    %c0_i32 = arith.constant 0 : i32
    %c0_i32_0 = arith.constant 0 : i32
    return %arg0, %c0_i32 : i32, i32
  }
  func.func @transform_1(%arg0: i32) -> (i32, i32) {
    %c0_i32 = arith.constant 0 : i32
    %c0_i32_0 = arith.constant 0 : i32
    return %arg0, %c0_i32 : i32, i32
  }
  func.func @transform_2(%arg0: i32) -> (i32, i32) {
    %c0_i32 = arith.constant 0 : i32
    %c0_i32_0 = arith.constant 0 : i32
    %c0_i32_1 = arith.constant 0 : i32
    return %c0_i32, %c0_i32_0 : i32, i32
  }
  func.func @transform_3(%arg0: i32) -> (i32, i32) {
    %c0_i32 = arith.constant 0 : i32
    %c0_i32_0 = arith.constant 0 : i32
    %c0_i32_1 = arith.constant 0 : i32
    return %c0_i32, %c0_i32_0 : i32, i32
  }
  func.func @transform_4(%arg0: i32) -> (i32, i32) {
    %c0_i32 = arith.constant 0 : i32
    %c0_i32_0 = arith.constant 0 : i32
    %c0_i32_1 = arith.constant 0 : i32
    return %c0_i32, %c0_i32_0 : i32, i32
  }
  func.func @transform_5(%arg0: i32) -> (i32, i32) {
    %c0_i32 = arith.constant 0 : i32
    %c0_i32_0 = arith.constant 0 : i32
    %c0_i32_1 = arith.constant 0 : i32
    return %c0_i32, %c0_i32_0 : i32, i32
  }
  func.func @transform_6(%arg0: i32) -> (i32, i32) {
    %c0_i32 = arith.constant 0 : i32
    %c0_i32_0 = arith.constant 0 : i32
    %c0_i32_1 = arith.constant 0 : i32
    return %c0_i32, %c0_i32_0 : i32, i32
  }
  func.func @transform_7(%arg0: i32) -> (i32, i32) {
    %c0_i32 = arith.constant 0 : i32
    %c0_i32_0 = arith.constant 0 : i32
    %c0_i32_1 = arith.constant 0 : i32
    return %c0_i32, %c0_i32_0 : i32, i32
  }
  func.func @transform_8(%arg0: i32) -> (i32, i32) {
    %c0_i32 = arith.constant 0 : i32
    %c0_i32_0 = arith.constant 0 : i32
    %c0_i32_1 = arith.constant 0 : i32
    return %c0_i32, %c0_i32_0 : i32, i32
  }
  func.func @transform_9(%arg0: i32) -> (i32, i32) {
    %c0_i32 = arith.constant 0 : i32
    %c0_i32_0 = arith.constant 0 : i32
    %c0_i32_1 = arith.constant 0 : i32
    return %c0_i32, %c0_i32_0 : i32, i32
  }
  func.func @transform_10(%arg0: i32) -> (i32, i32) {
    %c0_i32 = arith.constant 0 : i32
    %c0_i32_0 = arith.constant 0 : i32
    %c0_i32_1 = arith.constant 0 : i32
    return %c0_i32, %c0_i32_0 : i32, i32
  }
  func.func @transform_11(%arg0: i32) -> (i32, i32) {
    %c0_i32 = arith.constant 0 : i32
    %c0_i32_0 = arith.constant 0 : i32
    %c0_i32_1 = arith.constant 0 : i32
    return %c0_i32, %c0_i32_0 : i32, i32
  }
  func.func @transform_12(%arg0: i32) -> (i32, i32) {
    %c0_i32 = arith.constant 0 : i32
    %c0_i32_0 = arith.constant 0 : i32
    %c0_i32_1 = arith.constant 0 : i32
    return %c0_i32, %c0_i32_0 : i32, i32
  }
  func.func @transform_13(%arg0: i32) -> (i32, i32) {
    %c0_i32 = arith.constant 0 : i32
    %c0_i32_0 = arith.constant 0 : i32
    %c0_i32_1 = arith.constant 0 : i32
    return %c0_i32, %c0_i32_0 : i32, i32
  }
  func.func @transform_14(%arg0: i32) -> (i32, i32) {
    %c0_i32 = arith.constant 0 : i32
    %c0_i32_0 = arith.constant 0 : i32
    %c0_i32_1 = arith.constant 0 : i32
    return %c0_i32, %c0_i32_0 : i32, i32
  }
  func.func @transform_15(%arg0: i32) -> (i32, i32) {
    %c0_i32 = arith.constant 0 : i32
    %c0_i32_0 = arith.constant 0 : i32
    return %arg0, %c0_i32 : i32, i32
  }
  func.func @transform_16(%arg0: i32) -> (i32, i32) {
    %c0_i32 = arith.constant 0 : i32
    %c0_i32_0 = arith.constant 0 : i32
    return %arg0, %c0_i32 : i32, i32
  }
  func.func @transform_17(%arg0: i32) -> (i32, i32) {
    %c0_i32 = arith.constant 0 : i32
    %c0_i32_0 = arith.constant 0 : i32
    return %arg0, %c0_i32 : i32, i32
  }
}

</mosaic_0001>

<bundles_post_ra>
// kernel: tpu_custom_call.1
= control target key start
LH: loop header
LB: loop body
LE: loop exit
PB: predicated region body
PF: predicated region fallthrough
CT: control target
= control target key end

     0   :  { %s5352_s0 = inlined_call_operand.vmem [shape: bf16[512,32], index: 0, kind: input, shape index: {}]   ;;  %s5353_s1 = inlined_call_operand.vmem [shape: s32[512,1], index: 1, kind: input, shape index: {}]   ;;  %s5354_s2 = inlined_call_operand.vmem [shape: f32[128,128], index: 2, kind: input, shape index: {}]   ;;  %s5355_s3 = inlined_call_operand.vmem [shape: bf16[32,256], index: 3, kind: input, shape index: {}]   ;;  %s5356_s4 = inlined_call_operand.vmem [shape: f32[1,128], index: 4, kind: input, shape index: {}]   ;;  %s5357_s5 = inlined_call_operand.vmem [shape: f32[1,128], index: 5, kind: input, shape index: {}]   ;;  %s5358_s6 = inlined_call_operand.vmem [shape: bf16[128,128], index: 6, kind: input, shape index: {}]   ;;  %s5359_s7 = inlined_call_operand.vmem [shape: bf16[128,128], index: 7, kind: input, shape index: {}]   ;;  %s5360_s8 = inlined_call_operand.vmem [shape: f32[1,128], index: 8, kind: input, shape index: {}]   ;;  %s5361_s9 = inlined_call_operand.vmem [shape: bf16[128,128], index: 9, kind: input, shape index: {}]   ;;  %s5362_s10 = inlined_call_operand.vmem [shape: f32[1,128], index: 10, kind: input, shape index: {}]   ;;  %s5363_s11 = inlined_call_operand.vmem [shape: bf16[128,128], index: 11, kind: input, shape index: {}]   ;;  %s5364_s12 = inlined_call_operand.vmem [shape: f32[1,128], index: 12, kind: input, shape index: {}]   ;;  %s5365_s13 = inlined_call_operand.vmem [shape: bf16[128,128], index: 13, kind: input, shape index: {}]   ;;  %s5366_s14 = inlined_call_operand.vmem [shape: f32[1,128], index: 14, kind: input, shape index: {}]   ;;  %s5367_s15 = inlined_call_operand.hbm [shape: f32[512,128], index: 15, kind: output, shape index: {0}]   ;;  %s5368_s16 = inlined_call_operand.hbm [shape: f32[512,128], index: 16, kind: output, shape index: {1}]   ;;  %s5369_s17 = inlined_call_operand.hbm [shape: f32[512,128], index: 17, kind: output, shape index: {2}]  }
   0x1   :  { %5377 = sst [smem:[#allocation33_spill]] %s5352_s0 }
   0x2   :  { %5378 = sst [smem:[#allocation34_spill]] %s5353_s1 }
   0x3   :  { %5379 = sst [smem:[#allocation35_spill]] %s5354_s2 }
   0x4   :  { %5380 = sst [smem:[#allocation36_spill]] %s5355_s3 }
   0x5   :  { %5381 = sst [smem:[#allocation37_spill]] %s5356_s4 }
   0x6   :  { %5382 = sst [smem:[#allocation38_spill]] %s5357_s5 }
   0x7   :  { %23 = vsyncpa [#allocation3], 0 }
   0x8   :  { %25 = vsyncpa [#allocation3 + $0x1], 0 }
   0x9   :  { %26 = vsyncpa [#allocation5], 0 }
   0xa   :  { %28 = vsyncpa [#allocation5 + $0x1], 0  ;;  %s4203_s24 = smov 0   ;;  %s4205_s25 = smov 0  }
   0xb   :  { %s4207_s26 = smov 0   ;;  %s4209_s27 = smov 0  }
   0xc LB: > { %5383 = sst [smem:[#allocation9_spill]] %s4092_s24  ;;  %s4224_s28 = sadd.s32 4294967295, %s4104_s27   ;;  %s4104_s27 = sphi %s4209_s27, %s5453_s27   ;;  %s4100_s26 = sphi %s4207_s26, %s5455_s26   ;;  %s4096_s25 = sphi %s4205_s25, %s5457_s25   ;;  %s4092_s24 = sphi %s4203_s24, %s5456_s24  }
   0xd   : > { %5384 = sst [smem:[#allocation10_spill]] %s4100_s26  ;;  %s5370_s29 = sadd.s32 4294967294, %s4104_s27  }
   0xe   : > { %s4228_s0 = sadd.s32 1, %s4104_s27   ;;  %s366_s30 = sadd.s32 1, %s4100_s26 }
   0xf   : > { %5385 = sst [smem:[#allocation11_spill]] %s4228_s0  ;;  %s363_s18 = ssub.s32 %s4104_s27, %s4228_s0 }
  0x10   : > { %p376_p0 = scmp.ne.s32.totalorder %s4100_s26, %s4096_s25  ;;  %p364_p1 = scmp.eq.s32.totalorder %s363_s18, 0 }
  0x11   : > { %p377_p2 = scmp.eq.s32.totalorder %s4224_s28, 1  ;;  %p382_p3 = scmp.ne.s32.totalorder %s4096_s25, %s4092_s24 }
  0x12   : > { %p383_p4 = scmp.eq.s32.totalorder %s5370_s29, 1  ;;  %p3199_p7 = scmp.ge.s32.totalorder %s4104_s27, 1 }
  0x13   : > { %s4241_s19 = scalar_select %p364_p1, %s4100_s26, %s366_s30  }
  0x14   : > { %p4243_p5 = por %p377_p2, %p376_p0  ;;  %p4247_p6 = por %p383_p4, %p382_p3 }
  0x15   : > { %5386 = sst [smem:[#allocation12_spill]] %s4241_s19  ;;  %p510_p8 = scmp.lt.s32.totalorder %s4104_s27, 3 }
  0x16   : > { %s5388_s20 = scalar_select %p4247_p6, 1, 0 }
  0x17   : > { %p511_p9 = pnand %p3199_p7, %p510_p8 }
  0x18   : > { %5389 = sst [smem:[#allocation13_spill]] %s5388_s20 }
  0x19   : > { %514 = sbr.rel (%p511_p9) target bundleno = 1266 (0x4f2), region = 80 }
  0x1e   : > { %s5390_s3 = sld [smem:[#allocation36_spill]]  ;;  %s3203_s23 = sshll.u32 %s4224_s28, 5  ;;  %v4106_v2 = vmov 0   ;;  %v3948_v5 = vld [vmem:[%s5359_s7 + $0x38] sm:$0xff]   ;;  %v3949_v6 = vld [vmem:[%s5359_s7 + $0x30] sm:$0xff]   ;;  %v3950_v7 = vld [vmem:[%s5359_s7 + $0x28] sm:$0xff]  }
  0x1f   : > { %842 = vmatprep.mubr.bf16.mxu0 %v4106_v2  ;;  %p578_p10 = scmp.lt.s32.totalorder %s3203_s23, 63  ;;  %3924 = vset.pattern.permute.xlu0 %v4106_v2  ;;  %vm761_vm0 = vcmask 261120   ;;  %v3951_v9 = vld [vmem:[%s5359_s7 + $0x20] sm:$0xff]   ;;  %s5392_s18 = sld [smem:[#allocation34_spill]]  ;;  %v3952_v42 = vld [vmem:[%s5359_s7 + $0x18] sm:$0xff]   ;;  %v3953_v46 = vld [vmem:[%s5359_s7 + $0x10] sm:$0xff]  }
  0x20   : > { %3925 = vset.pattern.permute.xlu1 %v4106_v2  ;;  %3535 = vmatprep.subr.bf16.mxu1 %v3948_v5  ;;  %v3954_v49 = vld [vmem:[%s5359_s7 + $0x8] sm:$0xff]   ;;  %v3955_v53 = vld [vmem:[%s5359_s7] sm:$0xff]   ;;  %s5393_s2 = sld [smem:[#allocation35_spill]]  ;;  %s5376_s19 = sand.u32 1, %s4096_s25  }
  0x21   : > { %s5459_s23 = smov (!%p578_p10, %s3203_s23), 63  ;;  %3536 = vmatpush3.bf16.msra.mxu1 %v3948_v5  ;;  %s5394_s4 = sld [smem:[#allocation37_spill]] }
  0x22   : > { %s3204_s20 = sshll.u32 %s5459_s23, 2  ;;  %3537 = vmatprep.subr.bf16.mxu1 %v3949_v6  ;;  %s5429_s5 = sld [smem:[#allocation38_spill]] }
  0x23   : > { %s5163_s30 = sshll.u32 %s4224_s28, 12 }
  0x24   : > { %v3926_v0 = vld [vmem:[%s5390_s3 + $0x14] ss:$8 sps:$4 sm:$0xff]   ;;  %v3928_v1 = vld [vmem:[%s5390_s3 + $0x10] ss:$8 sps:$4 sm:$0xff]   ;;  %v3929_v3 = vld [vmem:[%s5390_s3 + $0x4] ss:$8 sps:$4 sm:$0xff]   ;;  %s5169_s21 = scalar_lea.hbm %s5368_s16, %s5163_s30 }
  0x25   : > { %822 = vmatprep.subr.bf16.mxu0 %v3926_v0  ;;  %v3931_v4 = vld [vmem:[%s5390_s3] ss:$8 sps:$4 sm:$0xff]   ;;  %s5391_s3 = sld [smem:[#allocation33_spill]]  ;;  %3538 = vmatpush3.bf16.msra.mxu1 %v3949_v6 }
  0x26   : > { %823 = vmatpush1.bf16.msra.mxu0 %v3928_v1  ;;  %3539 = vmatprep.subr.bf16.mxu1 %v3950_v7  ;;  %v1843_v56 = vld [vmem:[%s5393_s2 + $0x78] sm:$0xff]  ;;  %v1842_v58 = vld [vmem:[%s5393_s2 + $0x70] sm:$0xff]  ;;  %v1841_v60 = vld [vmem:[%s5393_s2 + $0x68] sm:$0xff] }
  0x27   : > { %824 = vmatprep.subr.bf16.mxu0 %v3929_v3  ;;  %v1840_v62 = vld [vmem:[%s5393_s2 + $0x60] sm:$0xff]  ;;  %v1839_v0 = vld [vmem:[%s5393_s2 + $0x58] sm:$0xff]  ;;  %v1838_v3 = vld [vmem:[%s5393_s2 + $0x50] sm:$0xff] }
  0x28   : > { %v1835_v5 = vld [vmem:[%s5393_s2 + $0x38] sm:$0xff]  ;;  %v1834_v6 = vld [vmem:[%s5393_s2 + $0x30] sm:$0xff] }
  0x29   : > { %3540 = vmatpush3.bf16.msra.mxu1 %v3950_v7  ;;  %v1833_v7 = vld [vmem:[%s5393_s2 + $0x28] sm:$0xff] }
  0x2a   : > { %825 = vmatpush1.bf16.msra.mxu0 %v3931_v4  ;;  %3541 = vmatprep.subr.bf16.mxu1 %v3951_v9  ;;  %v1837_v4 = vld [vmem:[%s5393_s2 + $0x48] sm:$0xff] }
  0x2b   : > { %s4281_s24 = scalar_lea.vmem %s5391_s3, %s3204_s20  ;;  %s3206_s3 = sshll.u32 %s5459_s23, 3  ;;  %3631 = vmatprep.subr.mxu0 %v1843_v56 }
  0x2c   : > { %v3932_v8 = vld [vmem:[%s4281_s24] sm:$0xff]   ;;  %v3933_v10 = vld [vmem:[%s4281_s24 + $0x8] sm:$0xff]   ;;  %s4295_s29 = scalar_lea.vmem %s5392_s18, %s3206_s3  ;;  %v3934_v11 = vld [vmem:[%s4281_s24 + $0x10] sm:$0xff]   ;;  %s3010_s20 = sand.u32 1, %s4224_s28  }
  0x2d   : > { %3227 = vmatmul.mubr.msk.bf16.vlgmr.msra.gmra.mxu0 %vm761_vm0, %v3932_v8  ;;  %3542 = vmatpush3.bf16.msra.mxu1 %v3951_v9  ;;  %v625_v12 = vld [vmem:[%s4295_s29] sm:$0xff]  ;;  %v627_v13 = vld [vmem:[%s4295_s29 + $0x10] sm:$0xff]  ;;  %v626_v14 = vld [vmem:[%s4295_s29 + $0x8] sm:$0xff]  ;;  %s5174_s22 = scalar_lea.sflag [#allocation5], %s3010_s20  ;;  %s4108_s28 = smov [#allocation4]  }
  0x2e   : > { %852 = vmatprep.mubr.bf16.mxu0 %v4106_v2  ;;  %1637 = vperm.xlu0 %3924, %v625_v12   ;;  %v628_v15 = vld [vmem:[%s4295_s29 + $0x18] sm:$0xff]  ;;  %v629_v16 = vld [vmem:[%s4295_s29 + $0x20] sm:$0xff]  ;;  %v630_v17 = vld [vmem:[%s4295_s29 + $0x28] sm:$0xff] }
  0x2f   : > { %1643 = vperm.xlu1 %3925, %v627_v13   ;;  %v3935_v18 = vld [vmem:[%s4281_s24 + $0x18] sm:$0xff]   ;;  %v631_v19 = vld [vmem:[%s4295_s29 + $0x30] sm:$0xff]  ;;  %v633_v21 = vld [vmem:[%s4295_s29 + $0x40] sm:$0xff]  ;;  %3543 = vmatprep.subr.bf16.mxu1 %v3952_v42 }
  0x30   : > { %v632_v20 = vld [vmem:[%s4295_s29 + $0x38] sm:$0xff]  ;;  %v634_v22 = vld [vmem:[%s4295_s29 + $0x48] sm:$0xff]  ;;  %v3936_v23 = vld [vmem:[%s4281_s24 + $0x20] sm:$0xff]   ;;  %3632 = vmatpush3.msra.mxu0 %v1843_v56 }
  0x31   : > { %v635_v24 = vld [vmem:[%s4295_s29 + $0x50] sm:$0xff]  ;;  %v636_v25 = vld [vmem:[%s4295_s29 + $0x58] sm:$0xff]  ;;  %v637_v26 = vld [vmem:[%s4295_s29 + $0x60] sm:$0xff]  ;;  %3544 = vmatpush3.bf16.msra.mxu1 %v3952_v42  ;;  %3633 = vmatprep.subr.mxu0 %v1842_v58 }
  0x32   : > { %1640 = vperm.xlu0 %3924, %v626_v14   ;;  %v638_v27 = vld [vmem:[%s4295_s29 + $0x68] sm:$0xff]  ;;  %v639_v29 = vld [vmem:[%s4295_s29 + $0x70] sm:$0xff]  ;;  %v640_v30 = vld [vmem:[%s4295_s29 + $0x78] sm:$0xff]  ;;  %3545 = vmatprep.subr.bf16.mxu1 %v3953_v46 }
  0x33   : > { %1646 = vperm.xlu1 %3925, %v628_v15   ;;  %v3937_v28 = vld [vmem:[%s4281_s24 + $0x28] sm:$0xff]   ;;  %v641_v31 = vld [vmem:[%s4295_s29 + $0x80] sm:$0xff]  ;;  %v3938_v33 = vld [vmem:[%s4281_s24 + $0x30] sm:$0xff]   ;;  %3634 = vmatpush3.msra.mxu0 %v1842_v58 }
  0x34   : > { %v642_v32 = vld [vmem:[%s4295_s29 + $0x88] sm:$0xff]  ;;  %v643_v34 = vld [vmem:[%s4295_s29 + $0x90] sm:$0xff]  ;;  %v644_v35 = vld [vmem:[%s4295_s29 + $0x98] sm:$0xff]  ;;  %3635 = vmatprep.subr.mxu0 %v1841_v60 }
  0x35   : > { %3228 = vmatmul.mubr.msk.bf16.gmra.mxu0 %vm761_vm0, %v3933_v10  ;;  %v645_v36 = vld [vmem:[%s4295_s29 + $0xa0] sm:$0xff]  ;;  %v646_v37 = vld [vmem:[%s4295_s29 + $0xa8] sm:$0xff]  ;;  %v3939_v38 = vld [vmem:[%s4281_s24 + $0x38] sm:$0xff]   ;;  %3546 = vmatpush3.bf16.msra.mxu1 %v3953_v46  ;;  %v1634_v10 = vlaneseq }
  0x36   : > { %862 = vmatprep.mubr.bf16.mxu0 %v4106_v2  ;;  %1649 = vperm.xlu0 %3924, %v629_v16   ;;  %v647_v39 = vld [vmem:[%s4295_s29 + $0xb0] sm:$0xff]  ;;  %v3940_v40 = vld [vmem:[%s4281_s24 + $0x40] sm:$0xff]   ;;  %v648_v41 = vld [vmem:[%s4295_s29 + $0xb8] sm:$0xff] }
  0x37   : > { %1652 = vperm.xlu1 %3925, %v630_v17   ;;  %v649_v43 = vld [vmem:[%s4295_s29 + $0xc0] sm:$0xff]  ;;  %v3941_v44 = vld [vmem:[%s4281_s24 + $0x48] sm:$0xff]   ;;  %v651_v47 = vld [vmem:[%s4295_s29 + $0xd0] sm:$0xff]  ;;  %3547 = vmatprep.subr.bf16.mxu1 %v3954_v49  ;;  %v4424_v13 = vand.u32 127, %v1634_v10 }
  0x38   : > { %v650_v45 = vld [vmem:[%s4295_s29 + $0xc8] sm:$0xff]  ;;  %v652_v48 = vld [vmem:[%s4295_s29 + $0xd8] sm:$0xff]  ;;  %v653_v50 = vld [vmem:[%s4295_s29 + $0xe0] sm:$0xff]  ;;  %3636 = vmatpush3.msra.mxu0 %v1841_v60 }
  0x39   : > { %v3942_v51 = vld [vmem:[%s4281_s24 + $0x50] sm:$0xff]   ;;  %3548 = vmatpush3.bf16.msra.mxu1 %v3954_v49  ;;  %v654_v52 = vld [vmem:[%s4295_s29 + $0xe8] sm:$0xff]  ;;  %v656_v55 = vld [vmem:[%s4295_s29 + $0xf8] sm:$0xff]  ;;  %3637 = vmatprep.subr.mxu0 %v1840_v62 }
  0x3a   : > { %1655 = vperm.xlu0 %3924, %v631_v19   ;;  %v655_v54 = vld [vmem:[%s4295_s29 + $0xf0] sm:$0xff]  ;;  %3549 = vmatprep.subr.bf16.mxu1 %v3955_v53  ;;  %v3943_v57 = vld [vmem:[%s4281_s24 + $0x58] sm:$0xff]   ;;  %v3944_v59 = vld [vmem:[%s4281_s24 + $0x60] sm:$0xff]   ;;  %s4624_s29 = sshll.u32 %s5376_s19, 8  ;;  %s3992_s19 = sshll.u32 %s4108_s28, 4  ;;  %s3993_s19 = int_to_ptr.vmem [resolvable:$false] %s3992_s19 }
  0x3b   : > { %1658 = vperm.xlu1 %3925, %v632_v20   ;;  %v3945_v61 = vld [vmem:[%s4281_s24 + $0x68] sm:$0xff]   ;;  %3638 = vmatpush3.msra.mxu0 %v1840_v62  ;;  %v3946_v63 = vld [vmem:[%s4281_s24 + $0x70] sm:$0xff]   ;;  %v3947_v1 = vld [vmem:[%s4281_s24 + $0x78] sm:$0xff]   ;;  %s4629_s24 = scalar_lea.vmem [#allocation6], %s4624_s29  ;;  %s4930_s26 = scalar_lea.vmem [#allocation4], %s4624_s29 }
  0x3c   : > { %3639 = vmatprep.subr.mxu0 %v1839_v0  ;;  %v1832_v8 = vld [vmem:[%s5393_s2 + $0x20] sm:$0xff]  ;;  %v1831_v9 = vld [vmem:[%s5393_s2 + $0x18] sm:$0xff]  ;;  %v1830_v12 = vld [vmem:[%s5393_s2 + $0x10] sm:$0xff]  ;;  %s3045_s0 = sshll.u32 %s4930_s26, 4  ;;  %s5172_s0 = int_to_ptr.vmem [resolvable:$true] %s3045_s0 }
  0x3d   : > { %3229 = vmatmul.mubr.msk.bf16.gmra.mxu0 %vm761_vm0, %v3934_v11  ;;  %3550 = vmatpush3.bf16.msra.mxu1 %v3955_v53  ;;  %v1829_v14 = vld [vmem:[%s5393_s2 + $0x8] sm:$0xff]  ;;  %v1828_v15 = vld [vmem:[%s5393_s2] sm:$0xff]  ;;  %s3988_s3 = scalar_lea.vmem %s5172_s0, 4096  ;;  %p3995_p0 = scmp.lt.s32.totalorder %s5172_s0, %s3993_s19 }
  0x3e   : > { %872 = vmatprep.mubr.bf16.mxu0 %v4106_v2  ;;  %1661 = vperm.xlu0 %3924, %v633_v21   ;;  %v4483_v42 = vld [vmem:[%s5394_s4] ss:$0 sm:$0xff]  ;;  %v3958_v10 = vld [vmem:[%s5361_s9 + $0x28] sm:$0xff]   ;;  %p3989_p11 = scmp.ne.s32.totalorder %s5172_s0, %s3988_s3 }
  0x3f   : > { %1664 = vperm.xlu1 %3925, %v634_v22   ;;  %3640 = vmatpush3.msra.mxu0 %v1839_v0 }
  0x40   : > { %3641 = vmatprep.subr.mxu0 %v1838_v3  ;;  %p3990_p12 = pnand %p3989_p11, %p4243_p5 }
  0x41   : > { %3642 = vmatpush3.msra.mxu0 %v1838_v3 }
  0x42   : > { %1667 = vperm.xlu0 %3924, %v635_v24   ;;  %3643 = vmatprep.subr.mxu0 %v1837_v4  ;;  %p3991_p13 = pneg %p3990_p12 }
  0x43   : > { %1670 = vperm.xlu1 %3925, %v636_v25   ;;  %3644 = vmatpush3.msra.mxu0 %v1837_v4 }
  0x45   : > { %3230 = vmatmul.mubr.msk.bf16.gmra.mxu0 %vm761_vm0, %v3935_v18  ;;  %v4107_v18 = vmov 1.0  }
  0x46   : > { %882 = vmatprep.mubr.bf16.mxu0 %v4106_v2  ;;  %1673 = vperm.xlu0 %3924, %v637_v26  }
  0x47   : > { %1676 = vperm.xlu1 %3925, %v638_v27  }
  0x4a   : > { %1679 = vperm.xlu0 %3924, %v639_v29  }
  0x4b   : > { %1682 = vperm.xlu1 %3925, %v640_v30  }
  0x4d   : > { %3231 = vmatmul.mubr.msk.bf16.gmra.mxu0 %vm761_vm0, %v3936_v23 }
  0x4e   : > { %892 = vmatprep.mubr.bf16.mxu0 %v4106_v2  ;;  %1685 = vperm.xlu0 %3924, %v641_v31  }
  0x4f   : > { %1688 = vperm.xlu1 %3925, %v642_v32  }
  0x52   : > { %1691 = vperm.xlu0 %3924, %v643_v34  }
  0x53   : > { %1694 = vperm.xlu1 %3925, %v644_v35  }
  0x55   : > { %3232 = vmatmul.mubr.msk.bf16.gmra.mxu0 %vm761_vm0, %v3937_v28 }
  0x56   : > { %902 = vmatprep.mubr.bf16.mxu0 %v4106_v2  ;;  %1697 = vperm.xlu0 %3924, %v645_v36  }
  0x57   : > { %1700 = vperm.xlu1 %3925, %v646_v37  }
  0x5a   : > { %1703 = vperm.xlu0 %3924, %v647_v39  }
  0x5b   : > { %1706 = vperm.xlu1 %3925, %v648_v41  }
  0x5d   : > { %3233 = vmatmul.mubr.msk.bf16.gmra.mxu0 %vm761_vm0, %v3938_v33 }
  0x5e   : > { %912 = vmatprep.mubr.bf16.mxu0 %v4106_v2  ;;  %1709 = vperm.xlu0 %3924, %v649_v43  }
  0x5f   : > { %1712 = vperm.xlu1 %3925, %v650_v45  }
  0x62   : > { %1715 = vperm.xlu0 %3924, %v651_v47   ;;  %v3956_v47 = vld [vmem:[%s5361_s9 + $0x38] sm:$0xff]  }
  0x63   : > { %1718 = vperm.xlu1 %3925, %v652_v48   ;;  %3583 = vmatprep.subr.bf16.mxu1 %v3956_v47 }
  0x65   : > { %3234 = vmatmul.mubr.msk.bf16.gmra.mxu0 %vm761_vm0, %v3939_v38 }
  0x66   : > { %922 = vmatprep.mubr.bf16.mxu0 %v4106_v2  ;;  %1721 = vperm.xlu0 %3924, %v653_v50  }
  0x67   : > { %1724 = vperm.xlu1 %3925, %v654_v52  }
  0x6a   : > { %1727 = vperm.xlu0 %3924, %v655_v54  }
  0x6b   : > { %1730 = vperm.xlu1 %3925, %v656_v55  }
  0x6d   : > { %3235 = vmatmul.mubr.msk.bf16.gmra.mxu0 %vm761_vm0, %v3940_v40 }
  0x6e   : > { %932 = vmatprep.mubr.bf16.mxu0 %v4106_v2 }
  0x75   : > { %3236 = vmatmul.mubr.msk.bf16.gmra.mxu0 %vm761_vm0, %v3941_v44 }
  0x76   : > { %942 = vmatprep.mubr.bf16.mxu0 %v4106_v2 }
  0x7d   : > { %3237 = vmatmul.mubr.msk.bf16.gmra.mxu0 %vm761_vm0, %v3942_v51 }
  0x7e   : > { %952 = vmatprep.mubr.bf16.mxu0 %v4106_v2 }
  0x85   : > { %3238 = vmatmul.mubr.msk.bf16.gmra.mxu0 %vm761_vm0, %v3943_v57 }
  0x86   : > { %962 = vmatprep.mubr.bf16.mxu0 %v4106_v2 }
  0x8d   : > { %3239 = vmatmul.mubr.msk.bf16.gmra.mxu0 %vm761_vm0, %v3944_v59 }
  0x8e   : > { %972 = vmatprep.mubr.bf16.mxu0 %v4106_v2 }
  0x95   : > { %3240 = vmatmul.mubr.msk.bf16.gmra.mxu0 %vm761_vm0, %v3945_v61 }
  0x96   : > { %982 = vmatprep.mubr.bf16.mxu0 %v4106_v2 }
  0x9d   : > { %3241 = vmatmul.mubr.msk.bf16.gmra.mxu0 %vm761_vm0, %v3946_v63 }
  0x9e   : > { %992 = vmatprep.mubr.bf16.mxu0 %v4106_v2  ;;  %v1836_v2 = vld [vmem:[%s5393_s2 + $0x40] sm:$0xff]  ;;  %s3994_s2 = scalar_lea.vmem %s3993_s19, 8192 }
  0x9f   : > { %3645 = vmatprep.subr.mxu0 %v1836_v2  ;;  %p3996_p1 = scmp.lt.s32.totalorder %s3994_s2, %s3988_s3 }
  0xa0   : > { %3646 = vmatpush3.msra.mxu0 %v1836_v2 }
  0xa1   : > { %3647 = vmatprep.subr.mxu0 %v1835_v5  ;;  %p3997_p2 = por %p3996_p1, %p3995_p0 }
  0xa2   : > { %3648 = vmatpush3.msra.mxu0 %v1835_v5  ;;  %v3957_v5 = vld [vmem:[%s5361_s9 + $0x30] sm:$0xff]  }
  0xa3   : > { %3649 = vmatprep.subr.mxu0 %v1834_v6  ;;  %p3998_p3 = pnand %p3997_p2, %p3991_p13 }
  0xa4   : > { %3650 = vmatpush3.msra.mxu0 %v1834_v6 }
  0xa5   : > { %3242 = vmatmul.mubr.msk.bf16.gmra.mxu0 %vm761_vm0, %v3947_v1  ;;  %3651 = vmatprep.subr.mxu0 %v1833_v7 }
  0xa6   : > { %3652 = vmatpush3.msra.mxu0 %v1833_v7 }
  0xa7   : > { %3653 = vmatprep.subr.mxu0 %v1832_v8 }
  0xa8   : > { %3654 = vmatpush3.msra.mxu0 %v1832_v8 }
  0xa9   : > { %3655 = vmatprep.subr.mxu0 %v1831_v9  ;;  %v1638_v11 = vpop.permute.xlu0 %1637 }
  0xaa   : > { %3656 = vmatpush3.msra.mxu0 %v1831_v9  ;;  %vm1732_vm1 = vcmp.eq.s32.totalorder %v1638_v11, %v4424_v13  ;;  %v1644_v16 = vpop.permute.xlu1 %1643 }
  0xab   : > { %3657 = vmatprep.subr.mxu0 %v1830_v12  ;;  %vm1734_vm2 = vcmp.eq.s32.totalorder %v1644_v16, %v4424_v13  ;;  %3663 = vmatprep.mubr.msk.f32.mxu0 %vm1732_vm1, %v4107_v18  ;;  %v3959_v16 = vld [vmem:[%s5361_s9 + $0x20] sm:$0xff]  }
  0xac   : > { %3658 = vmatpush3.msra.mxu0 %v1830_v12 }
  0xad   : > { %3659 = vmatprep.subr.mxu0 %v1829_v14  ;;  %v1641_v17 = vpop.permute.xlu0 %1640 }
  0xae   : > { %3660 = vmatpush3.msra.mxu0 %v1829_v14  ;;  %vm1733_vm3 = vcmp.eq.s32.totalorder %v1641_v17, %v4424_v13  ;;  %v1647_v19 = vpop.permute.xlu1 %1646 }
  0xaf   : > { %3661 = vmatprep.subr.mxu0 %v1828_v15  ;;  %vm1735_vm4 = vcmp.eq.s32.totalorder %v1647_v19, %v4424_v13 }
  0xb0   : > { %3662 = vmatpush3.msra.mxu0 %v1828_v15 }
  0xb1   : > { %3664 = vmatmul.mubr.msk.f32.vlgmr.msra.gmra.mxu0 %vm1733_vm3, %v4107_v18  ;;  %v1650_v20 = vpop.permute.xlu0 %1649 }
  0xb2   : > { %3666 = vmatprep.mubr.msk.f32.mxu0 %vm1734_vm2, %v4107_v18  ;;  %vm1736_vm5 = vcmp.eq.s32.totalorder %v1650_v20, %v4424_v13  ;;  %v1653_v21 = vpop.permute.xlu1 %1652 }
  0xb3   : > { %vm1737_vm6 = vcmp.eq.s32.totalorder %v1653_v21, %v4424_v13  ;;  %v3960_v21 = vld [vmem:[%s5361_s9 + $0x18] sm:$0xff]  }
  0xb5   : > { %3667 = vmatmul.mubr.msk.f32.gmra.mxu0 %vm1735_vm4, %v4107_v18  ;;  %v1656_v22 = vpop.permute.xlu0 %1655 }
  0xb6   : > { %3669 = vmatprep.mubr.msk.f32.mxu0 %vm1736_vm5, %v4107_v18  ;;  %vm1738_vm7 = vcmp.eq.s32.totalorder %v1656_v22, %v4424_v13  ;;  %v1659_v23 = vpop.permute.xlu1 %1658 }
  0xb7   : > { %vm1739_vm8 = vcmp.eq.s32.totalorder %v1659_v23, %v4424_v13 }
  0xb9   : > { %3670 = vmatmul.mubr.msk.f32.gmra.mxu0 %vm1737_vm6, %v4107_v18  ;;  %v1662_v24 = vpop.permute.xlu0 %1661 }
  0xba   : > { %3672 = vmatprep.mubr.msk.f32.mxu0 %vm1738_vm7, %v4107_v18  ;;  %vm1740_vm9 = vcmp.eq.s32.totalorder %v1662_v24, %v4424_v13  ;;  %v1665_v25 = vpop.permute.xlu1 %1664 }
  0xbb   : > { %vm1741_vm10 = vcmp.eq.s32.totalorder %v1665_v25, %v4424_v13 }
  0xbd   : > { %3673 = vmatmul.mubr.msk.f32.gmra.mxu0 %vm1739_vm8, %v4107_v18  ;;  %v1668_v26 = vpop.permute.xlu0 %1667 }
  0xbe   : > { %3675 = vmatprep.mubr.msk.f32.mxu0 %vm1740_vm9, %v4107_v18  ;;  %vm1742_vm11 = vcmp.eq.s32.totalorder %v1668_v26, %v4424_v13  ;;  %v1671_v27 = vpop.permute.xlu1 %1670 }
  0xbf   : > { %vm1743_vm12 = vcmp.eq.s32.totalorder %v1671_v27, %v4424_v13 }
  0xc1   : > { %3676 = vmatmul.mubr.msk.f32.gmra.mxu0 %vm1741_vm10, %v4107_v18  ;;  %v1674_v28 = vpop.permute.xlu0 %1673 }
  0xc2   : > { %3678 = vmatprep.mubr.msk.f32.mxu0 %vm1742_vm11, %v4107_v18  ;;  %vm1744_vm13 = vcmp.eq.s32.totalorder %v1674_v28, %v4424_v13  ;;  %v1677_v29 = vpop.permute.xlu1 %1676 }
  0xc3   : > { %vm1745_vm14 = vcmp.eq.s32.totalorder %v1677_v29, %v4424_v13 }
  0xc5   : > { %3679 = vmatmul.mubr.msk.f32.gmra.mxu0 %vm1743_vm12, %v4107_v18  ;;  %v1680_v30 = vpop.permute.xlu0 %1679 }
  0xc6   : > { %3681 = vmatprep.mubr.msk.f32.mxu0 %vm1744_vm13, %v4107_v18  ;;  %vm1746_vm15 = vcmp.eq.s32.totalorder %v1680_v30, %v4424_v13  ;;  %v1683_v31 = vpop.permute.xlu1 %1682 }
  0xc7   : > { %vm1747_vm0 = vcmp.eq.s32.totalorder %v1683_v31, %v4424_v13 }
  0xc9   : > { %3682 = vmatmul.mubr.msk.f32.gmra.mxu0 %vm1745_vm14, %v4107_v18  ;;  %v1686_v32 = vpop.permute.xlu0 %1685 }
  0xca   : > { %3684 = vmatprep.mubr.msk.f32.mxu0 %vm1746_vm15, %v4107_v18  ;;  %vm1748_vm1 = vcmp.eq.s32.totalorder %v1686_v32, %v4424_v13  ;;  %v1689_v33 = vpop.permute.xlu1 %1688 }
  0xcb   : > { %vm1749_vm2 = vcmp.eq.s32.totalorder %v1689_v33, %v4424_v13 }
  0xcd   : > { %3685 = vmatmul.mubr.msk.f32.gmra.mxu0 %vm1747_vm0, %v4107_v18  ;;  %v1692_v34 = vpop.permute.xlu0 %1691 }
  0xce   : > { %3687 = vmatprep.mubr.msk.f32.mxu0 %vm1748_vm1, %v4107_v18  ;;  %vm1750_vm3 = vcmp.eq.s32.totalorder %v1692_v34, %v4424_v13  ;;  %v1695_v35 = vpop.permute.xlu1 %1694 }
  0xcf   : > { %vm1751_vm4 = vcmp.eq.s32.totalorder %v1695_v35, %v4424_v13 }
  0xd1   : > { %3688 = vmatmul.mubr.msk.f32.gmra.mxu0 %vm1749_vm2, %v4107_v18  ;;  %v1698_v36 = vpop.permute.xlu0 %1697 }
  0xd2   : > { %3690 = vmatprep.mubr.msk.f32.mxu0 %vm1750_vm3, %v4107_v18  ;;  %vm1752_vm5 = vcmp.eq.s32.totalorder %v1698_v36, %v4424_v13  ;;  %v1701_v37 = vpop.permute.xlu1 %1700 }
  0xd3   : > { %vm1753_vm6 = vcmp.eq.s32.totalorder %v1701_v37, %v4424_v13 }
  0xd5   : > { %3691 = vmatmul.mubr.msk.f32.gmra.mxu0 %vm1751_vm4, %v4107_v18  ;;  %v1704_v38 = vpop.permute.xlu0 %1703 }
  0xd6   : > { %3693 = vmatprep.mubr.msk.f32.mxu0 %vm1752_vm5, %v4107_v18  ;;  %vm1754_vm7 = vcmp.eq.s32.totalorder %v1704_v38, %v4424_v13  ;;  %v1707_v39 = vpop.permute.xlu1 %1706 }
  0xd7   : > { %vm1755_vm8 = vcmp.eq.s32.totalorder %v1707_v39, %v4424_v13 }
  0xd9   : > { %3694 = vmatmul.mubr.msk.f32.gmra.mxu0 %vm1753_vm6, %v4107_v18  ;;  %v1710_v40 = vpop.permute.xlu0 %1709 }
  0xda   : > { %3696 = vmatprep.mubr.msk.f32.mxu0 %vm1754_vm7, %v4107_v18  ;;  %vm1756_vm9 = vcmp.eq.s32.totalorder %v1710_v40, %v4424_v13  ;;  %v1713_v43 = vpop.permute.xlu1 %1712 }
  0xdb   : > { %vm1757_vm10 = vcmp.eq.s32.totalorder %v1713_v43, %v4424_v13 }
  0xdd   : > { %3697 = vmatmul.mubr.msk.f32.gmra.mxu0 %vm1755_vm8, %v4107_v18  ;;  %v1716_v45 = vpop.permute.xlu0 %1715 }
  0xde   : > { %3699 = vmatprep.mubr.msk.f32.mxu0 %vm1756_vm9, %v4107_v18  ;;  %vm1758_vm11 = vcmp.eq.s32.totalorder %v1716_v45, %v4424_v13  ;;  %v1719_v49 = vpop.permute.xlu1 %1718 }
  0xdf   : > { %vm1759_vm12 = vcmp.eq.s32.totalorder %v1719_v49, %v4424_v13 }
  0xe1   : > { %3700 = vmatmul.mubr.msk.f32.gmra.mxu0 %vm1757_vm10, %v4107_v18  ;;  %v1722_v52 = vpop.permute.xlu0 %1721 }
  0xe2   : > { %3702 = vmatprep.mubr.msk.f32.mxu0 %vm1758_vm11, %v4107_v18  ;;  %vm1760_vm13 = vcmp.eq.s32.totalorder %v1722_v52, %v4424_v13  ;;  %v1725_v56 = vpop.permute.xlu1 %1724 }
  0xe3   : > { %vm1761_vm14 = vcmp.eq.s32.totalorder %v1725_v56, %v4424_v13 }
  0xe5   : > { %3703 = vmatmul.mubr.msk.f32.gmra.mxu0 %vm1759_vm12, %v4107_v18  ;;  %v1728_v59 = vpop.permute.xlu0 %1727 }
  0xe6   : > { %3705 = vmatprep.mubr.msk.f32.mxu0 %vm1760_vm13, %v4107_v18  ;;  %vm1762_vm15 = vcmp.eq.s32.totalorder %v1728_v59, %v4424_v13  ;;  %v1731_v62 = vpop.permute.xlu1 %1730 }
  0xe7   : > { %vm1763_vm0 = vcmp.eq.s32.totalorder %v1731_v62, %v4424_v13 }
  0xe9   : > { %3706 = vmatmul.mubr.msk.f32.gmra.mxu0 %vm1761_vm14, %v4107_v18 }
  0xea   : > { %3708 = vmatprep.mubr.msk.f32.mxu0 %vm1762_vm15, %v4107_v18 }
  0xed   : > { %v844_v41 = vpop.f32.mrf.mxu0  ;;  %3709 = vmatmul.mubr.msk.f32.gmra.mxu0 %vm1763_vm0, %v4107_v18 }
  0xee   : > { %v1010_v46 = vadd.f32 %v4483_v42, %v844_v41 }
  0xef   : > { %v4488_v44 = vpop.f32.mrf.mxu0 }
  0xf0   : > { %v1042_v53 = vmax.f32 %v1010_v46, 0.0 }
  0xf1   : > { %v848_v48 = vpop.f32.mrf.mxu0 }
  0xf2   : > { %v1011_v50 = vadd.f32 %v4483_v42, %v848_v48 }
  0xf3   : > { %v4499_v51 = vpop.f32.mrf.mxu0 }
  0xf4   : > { %v1043_v54 = vmax.f32 %v1011_v50, 0.0 }
  0xf5   : > { %v854_v55 = vpop.f32.mrf.mxu0 }
  0xf6   : > { %v1074_v57 = vpack.c.bf16 %v1043_v54, %v1042_v53  ;;  %v1012_v60 = vadd.f32 %v4483_v42, %v854_v55 }
  0xf7   : > { %v4505_v58 = vpop.f32.mrf.mxu0 }
  0xf8   : > { %3551 = vmatprep.mubr.bf16.mxu1 %v1074_v57  ;;  %v1044_v1 = vmax.f32 %v1012_v60, 0.0 }
  0xf9   : > { %v858_v61 = vpop.f32.mrf.mxu0 }
  0xfa   : > { %v1013_v63 = vadd.f32 %v4483_v42, %v858_v61 }
  0xfb   : > { %v4513_v0 = vpop.f32.mrf.mxu0 }
  0xfc   : > { %v1045_v3 = vmax.f32 %v1013_v63, 0.0 }
  0xfd   : > { %v864_v4 = vpop.f32.mrf.mxu0 }
  0xfe   : > { %v1075_v2 = vpack.c.bf16 %v1045_v3, %v1044_v1  ;;  %v1014_v7 = vadd.f32 %v4483_v42, %v864_v4 }
  0xff   : > { %v4519_v6 = vpop.f32.mrf.mxu0 }
 0x100   : > { %3552 = vmatmul.mubr.bf16.vlgmr.msra.gmra.mxu1 %v1075_v2  ;;  %v1046_v12 = vmax.f32 %v1014_v7, 0.0 }
 0x101   : > { %v868_v8 = vpop.f32.mrf.mxu0  ;;  %3584 = vmatpush3.bf16.msra.mxu1 %v3956_v47 }
 0x102   : > { %v1015_v9 = vadd.f32 %v4483_v42, %v868_v8  ;;  %3585 = vmatprep.subr.bf16.mxu1 %v3957_v5 }
 0x103   : > { %v4526_v11 = vpop.f32.mrf.mxu0 }
 0x104   : > { %v1047_v13 = vmax.f32 %v1015_v9, 0.0 }
 0x105   : > { %v874_v14 = vpop.f32.mrf.mxu0  ;;  %3586 = vmatpush3.bf16.msra.mxu1 %v3957_v5 }
 0x106   : > { %v1076_v15 = vpack.c.bf16 %v1047_v13, %v1046_v12  ;;  %3587 = vmatprep.subr.bf16.mxu1 %v3958_v10  ;;  %v1016_v18 = vadd.f32 %v4483_v42, %v874_v14 }
 0x107   : > { %v4531_v17 = vpop.f32.mrf.mxu0 }
 0x108   : > { %3555 = vmatprep.mubr.bf16.mxu1 %v1076_v15  ;;  %v1048_v23 = vmax.f32 %v1016_v18, 0.0 }
 0x109   : > { %v878_v19 = vpop.f32.mrf.mxu0  ;;  %3588 = vmatpush3.bf16.msra.mxu1 %v3958_v10 }
 0x10a   : > { %v1017_v20 = vadd.f32 %v4483_v42, %v878_v19  ;;  %3589 = vmatprep.subr.bf16.mxu1 %v3959_v16 }
 0x10b   : > { %v4538_v22 = vpop.f32.mrf.mxu0 }
 0x10c   : > { %v1049_v24 = vmax.f32 %v1017_v20, 0.0 }
 0x10d   : > { %v884_v25 = vpop.f32.mrf.mxu0  ;;  %3590 = vmatpush3.bf16.msra.mxu1 %v3959_v16 }
 0x10e   : > { %v1077_v26 = vpack.c.bf16 %v1049_v24, %v1048_v23  ;;  %3591 = vmatprep.subr.bf16.mxu1 %v3960_v21  ;;  %v1018_v28 = vadd.f32 %v4483_v42, %v884_v25 }
 0x10f   : > { %v4540_v27 = vpop.f32.mrf.mxu0 }
 0x110   : > { %3556 = vmatmul.mubr.bf16.gmra.mxu1 %v1077_v26  ;;  %v1050_v32 = vmax.f32 %v1018_v28, 0.0 }
 0x111   : > { %v888_v29 = vpop.f32.mrf.mxu0  ;;  %3592 = vmatpush3.bf16.msra.mxu1 %v3960_v21 }
 0x112   : > { %v1019_v30 = vadd.f32 %v4483_v42, %v888_v29  ;;  %v3961_v29 = vld [vmem:[%s5361_s9 + $0x10] sm:$0xff]  }
 0x113   : > { %v4544_v31 = vpop.f32.mrf.mxu0  ;;  %3593 = vmatprep.subr.bf16.mxu1 %v3961_v29 }
 0x114   : > { %v1051_v33 = vmax.f32 %v1019_v30, 0.0 }
 0x115   : > { %v894_v34 = vpop.f32.mrf.mxu0  ;;  %3594 = vmatpush3.bf16.msra.mxu1 %v3961_v29 }
 0x116   : > { %v1078_v35 = vpack.c.bf16 %v1051_v33, %v1050_v32  ;;  %v1020_v37 = vadd.f32 %v4483_v42, %v894_v34 }
 0x117   : > { %v4546_v36 = vpop.f32.mrf.mxu0 }
 0x118   : > { %3559 = vmatprep.mubr.bf16.mxu1 %v1078_v35  ;;  %v1052_v41 = vmax.f32 %v1020_v37, 0.0  ;;  %v3962_v37 = vld [vmem:[%s5361_s9 + $0x8] sm:$0xff]  }
 0x119   : > { %v898_v38 = vpop.f32.mrf.mxu0  ;;  %3595 = vmatprep.subr.bf16.mxu1 %v3962_v37 }
 0x11a   : > { %v1021_v39 = vadd.f32 %v4483_v42, %v898_v38  ;;  %3596 = vmatpush3.bf16.msra.mxu1 %v3962_v37 }
 0x11b   : > { %v4550_v40 = vpop.f32.mrf.mxu0 }
 0x11c   : > { %v1053_v43 = vmax.f32 %v1021_v39, 0.0 }
 0x11d   : > { %v904_v45 = vpop.f32.mrf.mxu0 }
 0x11e   : > { %v1079_v46 = vpack.c.bf16 %v1053_v43, %v1052_v41  ;;  %v1022_v48 = vadd.f32 %v4483_v42, %v904_v45  ;;  %v3963_v45 = vld [vmem:[%s5361_s9] sm:$0xff]  }
 0x11f   : > { %v4552_v47 = vpop.f32.mrf.mxu0  ;;  %3597 = vmatprep.subr.bf16.mxu1 %v3963_v45 }
 0x120   : > { %3560 = vmatmul.mubr.bf16.gmra.mxu1 %v1079_v46  ;;  %v1054_v53 = vmax.f32 %v1022_v48, 0.0 }
 0x121   : > { %v908_v49 = vpop.f32.mrf.mxu0  ;;  %3598 = vmatpush3.bf16.msra.mxu1 %v3963_v45 }
 0x122   : > { %v1023_v50 = vadd.f32 %v4483_v42, %v908_v49 }
 0x123   : > { %v4556_v52 = vpop.f32.mrf.mxu0 }
 0x124   : > { %5395 = vst [vmem:[#allocation14_spill] sm:$0xff] %v4556_v52  ;;  %v1055_v54 = vmax.f32 %v1023_v50, 0.0  ;;  %v3965_v52 = vld [vmem:[%s5358_s6 + $0x30] sm:$0xff]  }
 0x125   : > { %v914_v55 = vpop.f32.mrf.mxu0 }
 0x126   : > { %v1080_v56 = vpack.c.bf16 %v1055_v54, %v1054_v53  ;;  %v1024_v59 = vadd.f32 %v4483_v42, %v914_v55 }
 0x127   : > { %v4558_v57 = vpop.f32.mrf.mxu0 }
 0x128   : > { %5396 = vst [vmem:[#allocation15_spill] sm:$0xff] %v4558_v57  ;;  %3563 = vmatprep.mubr.bf16.mxu1 %v1080_v56  ;;  %v1056_v63 = vmax.f32 %v1024_v59, 0.0 }
 0x129   : > { %v918_v60 = vpop.f32.mrf.mxu0 }
 0x12a   : > { %v1025_v61 = vadd.f32 %v4483_v42, %v918_v60 }
 0x12b   : > { %v4562_v62 = vpop.f32.mrf.mxu0 }
 0x12c   : > { %5397 = vst [vmem:[#allocation16_spill] sm:$0xff] %v4562_v62  ;;  %v1057_v1 = vmax.f32 %v1025_v61, 0.0 }
 0x12d   : > { %v924_v3 = vpop.f32.mrf.mxu0 }
 0x12e   : > { %v1081_v4 = vpack.c.bf16 %v1057_v1, %v1056_v63  ;;  %v1026_v5 = vadd.f32 %v4483_v42, %v924_v3 }
 0x12f   : > { %v4564_v2 = vpop.f32.mrf.mxu0 }
 0x130   : > { %5398 = vst [vmem:[#allocation17_spill] sm:$0xff] %v4564_v2  ;;  %3564 = vmatmul.mubr.bf16.gmra.mxu1 %v1081_v4  ;;  %v1058_v10 = vmax.f32 %v1026_v5, 0.0 }
 0x131   : > { %v928_v7 = vpop.f32.mrf.mxu0 }
 0x132   : > { %v1027_v8 = vadd.f32 %v4483_v42, %v928_v7 }
 0x133   : > { %v4568_v9 = vpop.f32.mrf.mxu0 }
 0x134   : > { %5399 = vst [vmem:[#allocation18_spill] sm:$0xff] %v4568_v9  ;;  %v1059_v12 = vmax.f32 %v1027_v8, 0.0 }
 0x135   : > { %v934_v13 = vpop.f32.mrf.mxu0 }
 0x136   : > { %v1082_v14 = vpack.c.bf16 %v1059_v12, %v1058_v10  ;;  %v1028_v16 = vadd.f32 %v4483_v42, %v934_v13 }
 0x137   : > { %v4570_v15 = vpop.f32.mrf.mxu0 }
 0x138   : > { %5400 = vst [vmem:[#allocation19_spill] sm:$0xff] %v4570_v15  ;;  %3567 = vmatprep.mubr.bf16.mxu1 %v1082_v14  ;;  %v1060_v21 = vmax.f32 %v1028_v16, 0.0 }
 0x139   : > { %v938_v18 = vpop.f32.mrf.mxu0 }
 0x13a   : > { %v1029_v19 = vadd.f32 %v4483_v42, %v938_v18 }
 0x13b   : > { %v4574_v20 = vpop.f32.mrf.mxu0 }
 0x13c   : > { %5401 = vst [vmem:[#allocation20_spill] sm:$0xff] %v4574_v20  ;;  %v1061_v23 = vmax.f32 %v1029_v19, 0.0 }
 0x13d   : > { %v944_v24 = vpop.f32.mrf.mxu0 }
 0x13e   : > { %v1083_v25 = vpack.c.bf16 %v1061_v23, %v1060_v21  ;;  %v1030_v28 = vadd.f32 %v4483_v42, %v944_v24 }
 0x13f   : > { %v4576_v26 = vpop.f32.mrf.mxu0 }
 0x140   : > { %5402 = vst [vmem:[#allocation21_spill] sm:$0xff] %v4576_v26  ;;  %3568 = vmatmul.mubr.bf16.gmra.mxu1 %v1083_v25  ;;  %v1062_v34 = vmax.f32 %v1030_v28, 0.0 }
 0x141   : > { %v948_v30 = vpop.f32.mrf.mxu0 }
 0x142   : > { %v1031_v32 = vadd.f32 %v4483_v42, %v948_v30 }
 0x143   : > { %v4583_v33 = vpop.f32.mrf.mxu0 }
 0x144   : > { %5403 = vst [vmem:[#allocation22_spill] sm:$0xff] %v4583_v33  ;;  %v1063_v35 = vmax.f32 %v1031_v32, 0.0 }
 0x145   : > { %v954_v38 = vpop.f32.mrf.mxu0 }
 0x146   : > { %v1084_v39 = vpack.c.bf16 %v1063_v35, %v1062_v34  ;;  %v1032_v43 = vadd.f32 %v4483_v42, %v954_v38 }
 0x147   : > { %v4588_v41 = vpop.f32.mrf.mxu0 }
 0x148   : > { %5404 = vst [vmem:[#allocation23_spill] sm:$0xff] %v4588_v41  ;;  %3571 = vmatprep.mubr.bf16.mxu1 %v1084_v39  ;;  %v1064_v50 = vmax.f32 %v1032_v43, 0.0 }
 0x149   : > { %v958_v46 = vpop.f32.mrf.mxu0 }
 0x14a   : > { %v1033_v48 = vadd.f32 %v4483_v42, %v958_v46 }
 0x14b   : > { %v4595_v49 = vpop.f32.mrf.mxu0 }
 0x14c   : > { %5405 = vst [vmem:[#allocation24_spill] sm:$0xff] %v4595_v49  ;;  %v1065_v53 = vmax.f32 %v1033_v48, 0.0 }
 0x14d   : > { %v964_v54 = vpop.f32.mrf.mxu0 }
 0x14e   : > { %v1085_v55 = vpack.c.bf16 %v1065_v53, %v1064_v50  ;;  %v1034_v59 = vadd.f32 %v4483_v42, %v964_v54  ;;  %v4796_v53 = vld [vmem:[%s5360_s8] ss:$0 sm:$0xff] }
 0x14f   : > { %v4597_v56 = vpop.f32.mrf.mxu0 }
 0x150   : > { %5406 = vst [vmem:[#allocation25_spill] sm:$0xff] %v4597_v56  ;;  %3572 = vmatmul.mubr.bf16.gmra.mxu1 %v1085_v55  ;;  %v1066_v1 = vmax.f32 %v1034_v59, 0.0 }
 0x151   : > { %v968_v60 = vpop.f32.mrf.mxu0 }
 0x152   : > { %v1035_v61 = vadd.f32 %v4483_v42, %v968_v60 }
 0x153   : > { %v4601_v63 = vpop.f32.mrf.mxu0 }
 0x154   : > { %5407 = vst [vmem:[#allocation26_spill] sm:$0xff] %v4601_v63  ;;  %v1067_v3 = vmax.f32 %v1035_v61, 0.0  ;;  %v4656_v61 = vld [vmem:[%s5358_s6 + $0x38] sm:$0xff]  }
 0x155   : > { %v974_v4 = vpop.f32.mrf.mxu0  ;;  %3711 = vmatprep.subr.bf16.mxu1 %v4656_v61 }
 0x156   : > { %v1086_v5 = vpack.c.bf16 %v1067_v3, %v1066_v1  ;;  %v1036_v8 = vadd.f32 %v4483_v42, %v974_v4 }
 0x157   : > { %v4603_v7 = vpop.f32.mrf.mxu0 }
 0x158   : > { %5408 = vst [vmem:[#allocation27_spill] sm:$0xff] %v4603_v7  ;;  %3575 = vmatprep.mubr.bf16.mxu1 %v1086_v5  ;;  %v1068_v14 = vmax.f32 %v1036_v8, 0.0 }
 0x159   : > { %v978_v10 = vpop.f32.mrf.mxu0 }
 0x15a   : > { %v1037_v12 = vadd.f32 %v4483_v42, %v978_v10 }
 0x15b   : > { %v4607_v13 = vpop.f32.mrf.mxu0 }
 0x15c   : > { %5409 = vst [vmem:[#allocation28_spill] sm:$0xff] %v4607_v13  ;;  %v1069_v16 = vmax.f32 %v1037_v12, 0.0 }
 0x15d   : > { %v984_v18 = vpop.f32.mrf.mxu0 }
 0x15e   : > { %v1087_v19 = vpack.c.bf16 %v1069_v16, %v1068_v14  ;;  %v1038_v23 = vadd.f32 %v4483_v42, %v984_v18 }
 0x15f   : > { %v4609_v21 = vpop.f32.mrf.mxu0 }
 0x160   : > { %5410 = vst [vmem:[#allocation29_spill] sm:$0xff] %v4609_v21  ;;  %3576 = vmatmul.mubr.bf16.gmra.mxu1 %v1087_v19  ;;  %v1070_v29 = vmax.f32 %v1038_v23, 0.0 }
 0x161   : > { %v988_v24 = vpop.f32.mrf.mxu0 }
 0x162   : > { %v1039_v25 = vadd.f32 %v4483_v42, %v988_v24 }
 0x163   : > { %v4613_v28 = vpop.f32.mrf.mxu0 }
 0x164   : > { %5411 = vst [vmem:[#allocation30_spill] sm:$0xff] %v4613_v28  ;;  %v1071_v30 = vmax.f32 %v1039_v25, 0.0 }
 0x165   : > { %v994_v32 = vpop.f32.mrf.mxu0 }
 0x166   : > { %v1088_v34 = vpack.c.bf16 %v1071_v30, %v1070_v29  ;;  %v1040_v37 = vadd.f32 %v4483_v42, %v994_v32 }
 0x167   : > { %v4615_v35 = vpop.f32.mrf.mxu0 }
 0x168   : > { %5412 = vst [vmem:[#allocation31_spill] sm:$0xff] %v4615_v35  ;;  %3579 = vmatprep.mubr.bf16.mxu1 %v1088_v34  ;;  %v1072_v43 = vmax.f32 %v1040_v37, 0.0 }
 0x169   : > { %v998_v38 = vpop.f32.mrf.mxu0 }
 0x16a   : > { %v1041_v39 = vadd.f32 %v4483_v42, %v998_v38 }
 0x16b   : > { %v4619_v48 = vpop.f32.mrf.mxu0 }
 0x16c   : > { %v1073_v45 = vmax.f32 %v1041_v39, 0.0  ;;  %5413 = vst [vmem:[#allocation32_spill] sm:$0xff] %v4619_v48 }
 0x16e   : > { %v1089_v46 = vpack.c.bf16 %v1073_v45, %v1072_v43 }
 0x170   : > { %3580 = vmatmul.mubr.bf16.gmra.mxu1 %v1089_v46 }
 0x171   : > { %v4626_v50 = vpop.f32.mrf.mxu0 }
 0x172   : > { %2070 = vst [vmem:[%s4629_s24 + $0x8] sm:$0xff] %v4626_v50 }
 0x173   : > { %v4633_v42 = vpop.f32.mrf.mxu0 }
 0x174   : > { %2069 = vst [vmem:[%s4629_s24] sm:$0xff] %v4633_v42 }
 0x175   : > { %v4639_v54 = vpop.f32.mrf.mxu0 }
 0x176   : > { %2072 = vst [vmem:[%s4629_s24 + $0x18] sm:$0xff] %v4639_v54 }
 0x177   : > { %v4643_v55 = vpop.f32.mrf.mxu0 }
 0x178   : > { %2071 = vst [vmem:[%s4629_s24 + $0x10] sm:$0xff] %v4643_v55 }
 0x179   : > { %v4647_v59 = vpop.f32.mrf.mxu0 }
 0x17a   : > { %2074 = vst [vmem:[%s4629_s24 + $0x28] sm:$0xff] %v4647_v59 }
 0x17b   : > { %v4658_v1 = vpop.f32.mrf.mxu0 }
 0x17c   : > { %2073 = vst [vmem:[%s4629_s24 + $0x20] sm:$0xff] %v4658_v1 }
 0x17d   : > { %v4665_v4 = vpop.f32.mrf.mxu0 }
 0x17e   : > { %2076 = vst [vmem:[%s4629_s24 + $0x38] sm:$0xff] %v4665_v4 }
 0x17f   : > { %v4669_v5 = vpop.f32.mrf.mxu0 }
 0x180   : > { %2075 = vst [vmem:[%s4629_s24 + $0x30] sm:$0xff] %v4669_v5 }
 0x181   : > { %v4675_v10 = vpop.f32.mrf.mxu0 }
 0x182   : > { %2078 = vst [vmem:[%s4629_s24 + $0x48] sm:$0xff] %v4675_v10 }
 0x183   : > { %v4679_v12 = vpop.f32.mrf.mxu0 }
 0x184   : > { %2077 = vst [vmem:[%s4629_s24 + $0x40] sm:$0xff] %v4679_v12 }
 0x185   : > { %v4685_v16 = vpop.f32.mrf.mxu0 }
 0x186   : > { %2080 = vst [vmem:[%s4629_s24 + $0x58] sm:$0xff] %v4685_v16 }
 0x187   : > { %v4689_v18 = vpop.f32.mrf.mxu0 }
 0x188   : > { %2079 = vst [vmem:[%s4629_s24 + $0x50] sm:$0xff] %v4689_v18 }
 0x189   : > { %v4693_v19 = vpop.f32.mrf.mxu0 }
 0x18a   : > { %2082 = vst [vmem:[%s4629_s24 + $0x68] sm:$0xff] %v4693_v19 }
 0x18b   : > { %v4699_v24 = vpop.f32.mrf.mxu0 }
 0x18c   : > { %2081 = vst [vmem:[%s4629_s24 + $0x60] sm:$0xff] %v4699_v24 }
 0x18d   : > { %v4705_v29 = vpop.f32.mrf.mxu0 }
 0x18e   : > { %2084 = vst [vmem:[%s4629_s24 + $0x78] sm:$0xff] %v4705_v29 }
 0x18f   : > { %v4709_v30 = vpop.f32.mrf.mxu0 }
 0x190   : > { %2083 = vst [vmem:[%s4629_s24 + $0x70] sm:$0xff] %v4709_v30 }
 0x191   : > { %v4715_v34 = vpop.f32.mrf.mxu0 }
 0x192   : > { %2086 = vst [vmem:[%s4629_s24 + $0x88] sm:$0xff] %v4715_v34 }
 0x193   : > { %v4719_v37 = vpop.f32.mrf.mxu0 }
 0x194   : > { %2085 = vst [vmem:[%s4629_s24 + $0x80] sm:$0xff] %v4719_v37 }
 0x195   : > { %v4725_v39 = vpop.f32.mrf.mxu0 }
 0x196   : > { %2088 = vst [vmem:[%s4629_s24 + $0x98] sm:$0xff] %v4725_v39 }
 0x197   : > { %v4729_v43 = vpop.f32.mrf.mxu0 }
 0x198   : > { %2087 = vst [vmem:[%s4629_s24 + $0x90] sm:$0xff] %v4729_v43 }
 0x199   : > { %v4733_v45 = vpop.f32.mrf.mxu0 }
 0x19a   : > { %2090 = vst [vmem:[%s4629_s24 + $0xa8] sm:$0xff] %v4733_v45 }
 0x19b   : > { %v4739_v32 = vpop.f32.mrf.mxu0 }
 0x19c   : > { %2089 = vst [vmem:[%s4629_s24 + $0xa0] sm:$0xff] %v4739_v32 }
 0x19d   : > { %v4745_v25 = vpop.f32.mrf.mxu0 }
 0x19e   : > { %2092 = vst [vmem:[%s4629_s24 + $0xb8] sm:$0xff] %v4745_v25 }
 0x19f   : > { %v4749_v23 = vpop.f32.mrf.mxu0 }
 0x1a0   : > { %2091 = vst [vmem:[%s4629_s24 + $0xb0] sm:$0xff] %v4749_v23 }
 0x1a1   : > { %v4755_v14 = vpop.f32.mrf.mxu0 }
 0x1a2   : > { %2094 = vst [vmem:[%s4629_s24 + $0xc8] sm:$0xff] %v4755_v14 }
 0x1a3   : > { %v4759_v8 = vpop.f32.mrf.mxu0 }
 0x1a4   : > { %2093 = vst [vmem:[%s4629_s24 + $0xc0] sm:$0xff] %v4759_v8 }
 0x1a5   : > { %v4765_v3 = vpop.f32.mrf.mxu0 }
 0x1a6   : > { %2096 = vst [vmem:[%s4629_s24 + $0xd8] sm:$0xff] %v4765_v3 }
 0x1a7   : > { %v4769_v60 = vpop.f32.mrf.mxu0 }
 0x1a8   : > { %2095 = vst [vmem:[%s4629_s24 + $0xd0] sm:$0xff] %v4769_v60 }
 0x1a9   : > { %v4773_v46 = vpop.f32.mrf.mxu0 }
 0x1aa   : > { %2098 = vst [vmem:[%s4629_s24 + $0xe8] sm:$0xff] %v4773_v46 }
 0x1ab   : > { %v4779_v28 = vpop.f32.mrf.mxu0 }
 0x1ac   : > { %2097 = vst [vmem:[%s4629_s24 + $0xe0] sm:$0xff] %v4779_v28 }
 0x1ad   : > { %v4785_v48 = vpop.f32.mrf.mxu0 }
 0x1ae   : > { %2100 = vst [vmem:[%s4629_s24 + $0xf8] sm:$0xff] %v4785_v48 }
 0x1af   : > { %v4789_v35 = vpop.f32.mrf.mxu0 }
 0x1b0   : > { %2099 = vst [vmem:[%s4629_s24 + $0xf0] sm:$0xff] %v4789_v35 }
 0x1c0   : > { %v3553_v21 = vpop.f32.mrf.mxu1 }
 0x1c1   : > { %v1204_v56 = vadd.f32 %v3553_v21, %v4796_v53 }
 0x1c2   : > { %v1195_v63 = vpop.f32.mrf.mxu1 }
 0x1c3   : > { %v1196_v7 = vadd.f32 %v4796_v53, %v1195_v63  ;;  %v1324_v20 = vmax.f32 %v1204_v56, 0.0 }
 0x1c4   : > { %v3554_v13 = vpop.f32.mrf.mxu1 }
 0x1c5   : > { %v1207_v38 = vadd.f32 %v3554_v13, %v4796_v53  ;;  %v1322_v26 = vmax.f32 %v1196_v7, 0.0 }
 0x1c6   : > { %v1198_v33 = vpop.f32.mrf.mxu1 }
 0x1c7   : > { %v1199_v49 = vadd.f32 %v4796_v53, %v1198_v33  ;;  %v1325_v41 = vmax.f32 %v1207_v38, 0.0  ;;  %v3966_v33 = vld [vmem:[%s5358_s6 + $0x28] sm:$0xff]  }
 0x1c9   : > { %v1323_v9 = vmax.f32 %v1199_v49, 0.0  ;;  %v1355_v2 = vpack.c.bf16 %v1325_v41, %v1324_v20 }
 0x1cb   : > { %v1354_v15 = vpack.c.bf16 %v1323_v9, %v1322_v26  ;;  %v3967_v9 = vld [vmem:[%s5358_s6 + $0x20] sm:$0xff]  }
 0x1cd   : > { %3599 = vmatprep.mubr.bf16.mxu1 %v1354_v15 }
 0x1ce   : > { %3600 = vmatmul.mubr.bf16.vlgmr.msra.gmra.mxu1 %v1355_v2 }
 0x1cf   : > { %3712 = vmatpush3.bf16.msra.mxu1 %v4656_v61 }
 0x1d0   : > { %v3557_v63 = vpop.f32.mrf.mxu1  ;;  %3713 = vmatprep.subr.bf16.mxu1 %v3965_v52 }
 0x1d1   : > { %v1220_v15 = vadd.f32 %v3557_v63, %v4796_v53  ;;  %v3969_v63 = vld [vmem:[%s5358_s6 + $0x10] sm:$0xff]  }
 0x1d2   : > { %v1211_v13 = vpop.f32.mrf.mxu1 }
 0x1d3   : > { %3714 = vmatpush3.bf16.msra.mxu1 %v3965_v52  ;;  %v1212_v20 = vadd.f32 %v4796_v53, %v1211_v13  ;;  %v3968_v52 = vld [vmem:[%s5358_s6 + $0x18] sm:$0xff]   ;;  %v1328_v61 = vmax.f32 %v1220_v15, 0.0 }
 0x1d4   : > { %v3558_v49 = vpop.f32.mrf.mxu1  ;;  %3715 = vmatprep.subr.bf16.mxu1 %v3966_v33 }
 0x1d5   : > { %v1223_v2 = vadd.f32 %v3558_v49, %v4796_v53  ;;  %v1326_v7 = vmax.f32 %v1212_v20, 0.0  ;;  %v3970_v49 = vld [vmem:[%s5358_s6 + $0x8] sm:$0xff]  }
 0x1d6   : > { %v1214_v26 = vpop.f32.mrf.mxu1 }
 0x1d7   : > { %v1215_v41 = vadd.f32 %v4796_v53, %v1214_v26  ;;  %3716 = vmatpush3.bf16.msra.mxu1 %v3966_v33  ;;  %v1329_v56 = vmax.f32 %v1223_v2, 0.0 }
 0x1d8   : > { %3717 = vmatprep.subr.bf16.mxu1 %v3967_v9 }
 0x1d9   : > { %v1327_v21 = vmax.f32 %v1215_v41, 0.0  ;;  %v1357_v13 = vpack.c.bf16 %v1329_v56, %v1328_v61 }
 0x1db   : > { %v1356_v38 = vpack.c.bf16 %v1327_v21, %v1326_v7  ;;  %3718 = vmatpush3.bf16.msra.mxu1 %v3967_v9  ;;  %v3971_v9 = vld [vmem:[%s5358_s6] sm:$0xff]  }
 0x1dc   : > { %3719 = vmatprep.subr.bf16.mxu1 %v3968_v52 }
 0x1dd   : > { %3603 = vmatprep.mubr.bf16.mxu1 %v1356_v38 }
 0x1de   : > { %3604 = vmatmul.mubr.bf16.gmra.mxu1 %v1357_v13 }
 0x1df   : > { %3720 = vmatpush3.bf16.msra.mxu1 %v3968_v52 }
 0x1e0   : > { %v3561_v33 = vpop.f32.mrf.mxu1  ;;  %3721 = vmatprep.subr.bf16.mxu1 %v3969_v63 }
 0x1e1   : > { %v1236_v41 = vadd.f32 %v3561_v33, %v4796_v53 }
 0x1e2   : > { %v1227_v20 = vpop.f32.mrf.mxu1 }
 0x1e3   : > { %3722 = vmatpush3.bf16.msra.mxu1 %v3969_v63  ;;  %v1228_v15 = vadd.f32 %v4796_v53, %v1227_v20  ;;  %v1332_v38 = vmax.f32 %v1236_v41, 0.0 }
 0x1e4   : > { %v3562_v2 = vpop.f32.mrf.mxu1  ;;  %3723 = vmatprep.subr.bf16.mxu1 %v3970_v49 }
 0x1e5   : > { %v1239_v26 = vadd.f32 %v3562_v2, %v4796_v53  ;;  %v1330_v21 = vmax.f32 %v1228_v15, 0.0 }
 0x1e6   : > { %v1230_v56 = vpop.f32.mrf.mxu1 }
 0x1e7   : > { %v1231_v52 = vadd.f32 %v4796_v53, %v1230_v56  ;;  %3724 = vmatpush3.bf16.msra.mxu1 %v3970_v49  ;;  %v1333_v7 = vmax.f32 %v1239_v26, 0.0 }
 0x1e8   : > { %3725 = vmatprep.subr.bf16.mxu1 %v3971_v9 }
 0x1e9   : > { %v1331_v61 = vmax.f32 %v1231_v52, 0.0  ;;  %v1359_v63 = vpack.c.bf16 %v1333_v7, %v1332_v38 }
 0x1eb   : > { %v1358_v13 = vpack.c.bf16 %v1331_v61, %v1330_v21  ;;  %3726 = vmatpush3.bf16.msra.mxu1 %v3971_v9 }
 0x1ed   : > { %3607 = vmatprep.mubr.bf16.mxu1 %v1358_v13 }
 0x1ee   : > { %3608 = vmatmul.mubr.bf16.gmra.mxu1 %v1359_v63 }
 0x1f0   : > { %v3565_v62 = vpop.f32.mrf.mxu1 }
 0x1f1   : > { %v1252_v56 = vadd.f32 %v3565_v62, %v4796_v53 }
 0x1f2   : > { %v1243_v20 = vpop.f32.mrf.mxu1 }
 0x1f3   : > { %v1244_v2 = vadd.f32 %v4796_v53, %v1243_v20  ;;  %v1336_v21 = vmax.f32 %v1252_v56, 0.0 }
 0x1f4   : > { %v3566_v57 = vpop.f32.mrf.mxu1 }
 0x1f5   : > { %v1255_v33 = vadd.f32 %v3566_v57, %v4796_v53  ;;  %v1334_v52 = vmax.f32 %v1244_v2, 0.0 }
 0x1f6   : > { %v1246_v49 = vpop.f32.mrf.mxu1 }
 0x1f7   : > { %v1247_v26 = vadd.f32 %v4796_v53, %v1246_v49  ;;  %v1337_v15 = vmax.f32 %v1255_v33, 0.0 }
 0x1f9   : > { %v1335_v41 = vmax.f32 %v1247_v26, 0.0  ;;  %v1361_v7 = vpack.c.bf16 %v1337_v15, %v1336_v21 }
 0x1fb   : > { %v1360_v9 = vpack.c.bf16 %v1335_v41, %v1334_v52 }
 0x1fd   : > { %3611 = vmatprep.mubr.bf16.mxu1 %v1360_v9 }
 0x1fe   : > { %3612 = vmatmul.mubr.bf16.gmra.mxu1 %v1361_v7 }
 0x200   : > { %v3569_v61 = vpop.f32.mrf.mxu1 }
 0x201   : > { %v1268_v62 = vadd.f32 %v3569_v61, %v4796_v53 }
 0x202   : > { %v1259_v38 = vpop.f32.mrf.mxu1 }
 0x203   : > { %v1260_v63 = vadd.f32 %v4796_v53, %v1259_v38  ;;  %v1340_v56 = vmax.f32 %v1268_v62, 0.0 }
 0x204   : > { %v3570_v13 = vpop.f32.mrf.mxu1 }
 0x205   : > { %v1271_v57 = vadd.f32 %v3570_v13, %v4796_v53  ;;  %v1338_v2 = vmax.f32 %v1260_v63, 0.0 }
 0x206   : > { %v1262_v20 = vpop.f32.mrf.mxu1 }
 0x207   : > { %v1263_v49 = vadd.f32 %v4796_v53, %v1262_v20  ;;  %v1341_v33 = vmax.f32 %v1271_v57, 0.0 }
 0x209   : > { %v1339_v26 = vmax.f32 %v1263_v49, 0.0  ;;  %v1363_v15 = vpack.c.bf16 %v1341_v33, %v1340_v56 }
 0x20b   : > { %v1362_v52 = vpack.c.bf16 %v1339_v26, %v1338_v2 }
 0x20d   : > { %3615 = vmatprep.mubr.bf16.mxu1 %v1362_v52 }
 0x20e   : > { %3616 = vmatmul.mubr.bf16.gmra.mxu1 %v1363_v15 }
 0x210   : > { %v3573_v41 = vpop.f32.mrf.mxu1 }
 0x211   : > { %v1284_v61 = vadd.f32 %v3573_v41, %v4796_v53 }
 0x212   : > { %v1275_v21 = vpop.f32.mrf.mxu1 }
 0x213   : > { %v1276_v7 = vadd.f32 %v4796_v53, %v1275_v21  ;;  %v1344_v62 = vmax.f32 %v1284_v61, 0.0 }
 0x214   : > { %v3574_v9 = vpop.f32.mrf.mxu1 }
 0x215   : > { %v1287_v38 = vadd.f32 %v3574_v9, %v4796_v53  ;;  %v1342_v63 = vmax.f32 %v1276_v7, 0.0 }
 0x216   : > { %v1278_v13 = vpop.f32.mrf.mxu1 }
 0x217   : > { %v1279_v20 = vadd.f32 %v4796_v53, %v1278_v13  ;;  %v1345_v57 = vmax.f32 %v1287_v38, 0.0 }
 0x219   : > { %v1343_v49 = vmax.f32 %v1279_v20, 0.0  ;;  %v1365_v33 = vpack.c.bf16 %v1345_v57, %v1344_v62 }
 0x21b   : > { %v1364_v2 = vpack.c.bf16 %v1343_v49, %v1342_v63 }
 0x21d   : > { %3619 = vmatprep.mubr.bf16.mxu1 %v1364_v2 }
 0x21e   : > { %3620 = vmatmul.mubr.bf16.gmra.mxu1 %v1365_v33 }
 0x220   : > { %v3577_v26 = vpop.f32.mrf.mxu1 }
 0x221   : > { %v1300_v41 = vadd.f32 %v3577_v26, %v4796_v53 }
 0x222   : > { %v1291_v56 = vpop.f32.mrf.mxu1 }
 0x223   : > { %v1292_v15 = vadd.f32 %v4796_v53, %v1291_v56  ;;  %v1348_v61 = vmax.f32 %v1300_v41, 0.0 }
 0x224   : > { %v3578_v52 = vpop.f32.mrf.mxu1 }
 0x225   : > { %v1303_v21 = vadd.f32 %v3578_v52, %v4796_v53  ;;  %v1346_v7 = vmax.f32 %v1292_v15, 0.0 }
 0x226   : > { %v1294_v9 = vpop.f32.mrf.mxu1 }
 0x227   : > { %v1295_v13 = vadd.f32 %v4796_v53, %v1294_v9  ;;  %v1349_v38 = vmax.f32 %v1303_v21, 0.0 }
 0x229   : > { %v1347_v20 = vmax.f32 %v1295_v13, 0.0  ;;  %v1367_v57 = vpack.c.bf16 %v1349_v38, %v1348_v61  ;;  %v5415_v61 = vpack.c.bf16 %v4639_v54, %v4643_v55  ;;  %v3972_v54 = vld [vmem:[%s5363_s11 + $0x38] sm:$0xff]   ;;  %v3973_v55 = vld [vmem:[%s5363_s11 + $0x30] sm:$0xff]  }
 0x22a   : > { %3759 = vmatprep.subr.bf16.mxu0 %v3972_v54 }
 0x22b   : > { %v1366_v63 = vpack.c.bf16 %v1347_v20, %v1346_v7  ;;  %v5414_v20 = vpack.c.bf16 %v4626_v50, %v4633_v42  ;;  %v5419_v50 = vpack.c.bf16 %v4685_v16, %v4689_v18  ;;  %v5420_v42 = vpack.c.bf16 %v4693_v19, %v4699_v24  ;;  %3760 = vmatpush3.bf16.msra.mxu0 %v3972_v54  ;;  %v4966_v54 = vld [vmem:[%s5365_s13 + $0x38] sm:$0xff]  }
 0x22c   : > { %3761 = vmatprep.subr.bf16.mxu0 %v3973_v55  ;;  %v5425_v16 = vpack.c.bf16 %v4745_v25, %v4749_v23  ;;  %v5426_v18 = vpack.c.bf16 %v4755_v14, %v4759_v8  ;;  %v5427_v19 = vpack.c.bf16 %v4765_v3, %v4769_v60  ;;  %v5428_v24 = vpack.c.bf16 %v4773_v46, %v4779_v28  ;;  %v3977_v23 = vld [vmem:[%s5363_s11 + $0x10] sm:$0xff]   ;;  %v3978_v28 = vld [vmem:[%s5363_s11 + $0x8] sm:$0xff]   ;;  %v4923_v3 = vld [vmem:[%s5362_s10] ss:$0 sm:$0xff] }
 0x22d   : > { %3623 = vmatprep.mubr.bf16.mxu1 %v1366_v63  ;;  %v5416_v63 = vpack.c.bf16 %v4647_v59, %v4658_v1  ;;  %v5421_v59 = vpack.c.bf16 %v4705_v29, %v4709_v30  ;;  %v5422_v1 = vpack.c.bf16 %v4715_v34, %v4719_v37  ;;  %v3976_v29 = vld [vmem:[%s5363_s11 + $0x18] sm:$0xff]   ;;  %v2116_v60 = vpack.c.bf16 %v4785_v48, %v4789_v35  ;;  %v3979_v35 = vld [vmem:[%s5363_s11] sm:$0xff]  }
 0x22e   : > { %3624 = vmatmul.mubr.bf16.gmra.mxu1 %v1367_v57  ;;  %v5418_v57 = vpack.c.bf16 %v4675_v10, %v4679_v12  ;;  %v3974_v10 = vld [vmem:[%s5363_s11 + $0x28] sm:$0xff]   ;;  %v3975_v12 = vld [vmem:[%s5363_s11 + $0x20] sm:$0xff]   ;;  %3855 = vmatprep.subr.bf16.mxu1 %v4966_v54 }
 0x22f   : > { %3762 = vmatpush3.bf16.msra.mxu0 %v3973_v55 }
 0x230   : > { %v3581_v49 = vpop.f32.mrf.mxu1  ;;  %3763 = vmatprep.subr.bf16.mxu0 %v3974_v10 }
 0x231   : > { %v1316_v26 = vadd.f32 %v3581_v49, %v4796_v53 }
 0x232   : > { %v1307_v62 = vpop.f32.mrf.mxu1 }
 0x233   : > { %v1308_v33 = vadd.f32 %v4796_v53, %v1307_v62  ;;  %v1352_v41 = vmax.f32 %v1316_v26, 0.0  ;;  %3764 = vmatpush3.bf16.msra.mxu0 %v3974_v10 }
 0x234   : > { %v3582_v2 = vpop.f32.mrf.mxu1  ;;  %3765 = vmatprep.subr.bf16.mxu0 %v3975_v12 }
 0x235   : > { %v1319_v56 = vadd.f32 %v3582_v2, %v4796_v53  ;;  %v1350_v15 = vmax.f32 %v1308_v33, 0.0 }
 0x236   : > { %v1310_v52 = vpop.f32.mrf.mxu1 }
 0x237   : > { %v1311_v9 = vadd.f32 %v4796_v53, %v1310_v52  ;;  %v1353_v21 = vmax.f32 %v1319_v56, 0.0  ;;  %v5417_v53 = vpack.c.bf16 %v4665_v4, %v4669_v5  ;;  %v5423_v4 = vpack.c.bf16 %v4725_v39, %v4729_v43  ;;  %3766 = vmatpush3.bf16.msra.mxu0 %v3975_v12 }
 0x238   : > { %v5424_v5 = vpack.c.bf16 %v4733_v45, %v4739_v32  ;;  %3767 = vmatprep.subr.bf16.mxu0 %v3976_v29 }
 0x239   : > { %v1351_v13 = vmax.f32 %v1311_v9, 0.0  ;;  %v1369_v38 = vpack.c.bf16 %v1353_v21, %v1352_v41 }
 0x23b   : > { %v1368_v7 = vpack.c.bf16 %v1351_v13, %v1350_v15  ;;  %3768 = vmatpush3.bf16.msra.mxu0 %v3976_v29 }
 0x23c   : > { %3769 = vmatprep.subr.bf16.mxu0 %v3977_v23 }
 0x23d   : > { %3627 = vmatprep.mubr.bf16.mxu1 %v1368_v7 }
 0x23e   : > { %3628 = vmatmul.mubr.bf16.gmra.mxu1 %v1369_v38 }
 0x23f   : > { %3727 = vmatprep.mubr.bf16.mxu1 %v5414_v20  ;;  %3770 = vmatpush3.bf16.msra.mxu0 %v3977_v23 }
 0x240   : > { %3771 = vmatprep.subr.bf16.mxu0 %v3978_v28 }
 0x243   : > { %3772 = vmatpush3.bf16.msra.mxu0 %v3978_v28  ;;  %v5010_v28 = vld [vmem:[%s5365_s13 + $0x10] sm:$0xff]  }
 0x244   : > { %3773 = vmatprep.subr.bf16.mxu0 %v3979_v35 }
 0x246   : > { %3728 = vmatmul.mubr.bf16.vlgmr.msra.gmra.mxu1 %v5415_v61 }
 0x247   : > { %3731 = vmatprep.mubr.bf16.mxu1 %v5416_v63  ;;  %3774 = vmatpush3.bf16.msra.mxu0 %v3979_v35 }
 0x248   : > { %3807 = vmatprep.subr.bf16.mxu0 %v4966_v54  ;;  %3863 = vmatpush3.bf16.msra.mxu1 %v4966_v54 }
 0x24e   : > { %3732 = vmatmul.mubr.bf16.gmra.mxu1 %v5417_v53 }
 0x24f   : > { %3735 = vmatprep.mubr.bf16.mxu1 %v5418_v57 }
 0x256   : > { %3736 = vmatmul.mubr.bf16.gmra.mxu1 %v5419_v50 }
 0x257   : > { %3739 = vmatprep.mubr.bf16.mxu1 %v5420_v42 }
 0x25e   : > { %3740 = vmatmul.mubr.bf16.gmra.mxu1 %v5421_v59 }
 0x25f   : > { %3743 = vmatprep.mubr.bf16.mxu1 %v5422_v1  ;;  %v4973_v1 = vld [vmem:[%s5365_s13 + $0x30] sm:$0xff]  }
 0x260   : > { %3856 = vmatprep.subr.bf16.mxu1 %v4973_v1 }
 0x261   : > { %3864 = vmatpush3.bf16.msra.mxu1 %v4973_v1 }
 0x266   : > { %3744 = vmatmul.mubr.bf16.gmra.mxu1 %v5423_v4 }
 0x267   : > { %3747 = vmatprep.mubr.bf16.mxu1 %v5424_v5 }
 0x26e   : > { %3748 = vmatmul.mubr.bf16.gmra.mxu1 %v5425_v16  ;;  %v4985_v16 = vld [vmem:[%s5365_s13 + $0x28] sm:$0xff]  }
 0x26f   : > { %3751 = vmatprep.mubr.bf16.mxu1 %v5426_v18  ;;  %3857 = vmatprep.subr.bf16.mxu1 %v4985_v16 }
 0x270   : > { %3865 = vmatpush3.bf16.msra.mxu1 %v4985_v16 }
 0x276   : > { %3752 = vmatmul.mubr.bf16.gmra.mxu1 %v5427_v19  ;;  %v4995_v19 = vld [vmem:[%s5365_s13 + $0x20] sm:$0xff]  }
 0x277   : > { %3755 = vmatprep.mubr.bf16.mxu1 %v5428_v24  ;;  %3858 = vmatprep.subr.bf16.mxu1 %v4995_v19  ;;  %v5002_v24 = vld [vmem:[%s5365_s13 + $0x18] sm:$0xff]  }
 0x278   : > { %3866 = vmatpush3.bf16.msra.mxu1 %v4995_v19 }
 0x279   : > { %3859 = vmatprep.subr.bf16.mxu1 %v5002_v24 }
 0x27c   : > { %3867 = vmatpush3.bf16.msra.mxu1 %v5002_v24 }
 0x27d   : > { %3860 = vmatprep.subr.bf16.mxu1 %v5010_v28 }
 0x27e   : > { %3756 = vmatmul.mubr.bf16.gmra.mxu1 %v2116_v60 }
 0x280   : > { %3868 = vmatpush3.bf16.msra.mxu1 %v5010_v28 }
 0x28e   : > { %v3601_v8 = vpop.f32.mrf.mxu1 }
 0x28f   : > { %v1484_v14 = vadd.f32 %v3601_v8, %v4923_v3 }
 0x290   : > { %v1475_v25 = vpop.f32.mrf.mxu1 }
 0x291   : > { %1604 = vst [vmem:[%s4930_s26 + $0x10] sm:$0xff] %v1484_v14  ;;  %v1476_v48 = vadd.f32 %v4923_v3, %v1475_v25 }
 0x292   : > { %v3602_v30 = vpop.f32.mrf.mxu1 }
 0x293   : > { %1602 = vst [vmem:[%s4930_s26] sm:$0xff] %v1476_v48  ;;  %v1487_v32 = vadd.f32 %v3602_v30, %v4923_v3 }
 0x294   : > { %v1478_v34 = vpop.f32.mrf.mxu1 }
 0x295   : > { %1605 = vst [vmem:[%s4930_s26 + $0x18] sm:$0xff] %v1487_v32  ;;  %v1479_v37 = vadd.f32 %v4923_v3, %v1478_v34 }
 0x297   : > { %1603 = vst [vmem:[%s4930_s26 + $0x8] sm:$0xff] %v1479_v37 }
 0x29e   : > { %v3605_v39 = vpop.f32.mrf.mxu1 }
 0x29f   : > { %v1500_v43 = vadd.f32 %v3605_v39, %v4923_v3 }
 0x2a0   : > { %v1491_v45 = vpop.f32.mrf.mxu1 }
 0x2a1   : > { %1608 = vst [vmem:[%s4930_s26 + $0x30] sm:$0xff] %v1500_v43  ;;  %v1492_v46 = vadd.f32 %v4923_v3, %v1491_v45 }
 0x2a2   : > { %v3606_v49 = vpop.f32.mrf.mxu1 }
 0x2a3   : > { %1606 = vst [vmem:[%s4930_s26 + $0x20] sm:$0xff] %v1492_v46  ;;  %v1503_v62 = vadd.f32 %v3606_v49, %v4923_v3 }
 0x2a4   : > { %v1494_v2 = vpop.f32.mrf.mxu1 }
 0x2a5   : > { %1609 = vst [vmem:[%s4930_s26 + $0x38] sm:$0xff] %v1503_v62  ;;  %v1495_v33 = vadd.f32 %v4923_v3, %v1494_v2 }
 0x2a7   : > { %1607 = vst [vmem:[%s4930_s26 + $0x28] sm:$0xff] %v1495_v33 }
 0x2ae   : > { %v3609_v56 = vpop.f32.mrf.mxu1 }
 0x2af   : > { %v1516_v26 = vadd.f32 %v3609_v56, %v4923_v3 }
 0x2b0   : > { %v1507_v52 = vpop.f32.mrf.mxu1 }
 0x2b1   : > { %1612 = vst [vmem:[%s4930_s26 + $0x50] sm:$0xff] %v1516_v26  ;;  %v1508_v9 = vadd.f32 %v4923_v3, %v1507_v52 }
 0x2b2   : > { %v3610_v21 = vpop.f32.mrf.mxu1 }
 0x2b3   : > { %1610 = vst [vmem:[%s4930_s26 + $0x40] sm:$0xff] %v1508_v9  ;;  %v1519_v15 = vadd.f32 %v3610_v21, %v4923_v3 }
 0x2b4   : > { %v1510_v13 = vpop.f32.mrf.mxu1 }
 0x2b5   : > { %1613 = vst [vmem:[%s4930_s26 + $0x58] sm:$0xff] %v1519_v15  ;;  %v1511_v41 = vadd.f32 %v4923_v3, %v1510_v13 }
 0x2b7   : > { %1611 = vst [vmem:[%s4930_s26 + $0x48] sm:$0xff] %v1511_v41 }
 0x2be   : > { %v3613_v7 = vpop.f32.mrf.mxu1 }
 0x2bf   : > { %v1532_v38 = vadd.f32 %v3613_v7, %v4923_v3 }
 0x2c0   : > { %v1523_v20 = vpop.f32.mrf.mxu1 }
 0x2c1   : > { %1616 = vst [vmem:[%s4930_s26 + $0x70] sm:$0xff] %v1532_v38  ;;  %v1524_v61 = vadd.f32 %v4923_v3, %v1523_v20  ;;  %v5043_v38 = vld [vmem:[%s5429_s5] ss:$0 sm:$0xff] }
 0x2c2   : > { %v3614_v63 = vpop.f32.mrf.mxu1 }
 0x2c3   : > { %1614 = vst [vmem:[%s4930_s26 + $0x60] sm:$0xff] %v1524_v61  ;;  %v1535_v53 = vadd.f32 %v3614_v63, %v4923_v3 }
 0x2c4   : > { %v1526_v57 = vpop.f32.mrf.mxu1 }
 0x2c5   : > { %1617 = vst [vmem:[%s4930_s26 + $0x78] sm:$0xff] %v1535_v53  ;;  %v1527_v50 = vadd.f32 %v4923_v3, %v1526_v57 }
 0x2c7   : > { %1615 = vst [vmem:[%s4930_s26 + $0x68] sm:$0xff] %v1527_v50 }
 0x2ce   : > { %v3617_v42 = vpop.f32.mrf.mxu1 }
 0x2cf   : > { %v1548_v55 = vadd.f32 %v3617_v42, %v4923_v3 }
 0x2d0   : > { %v1539_v59 = vpop.f32.mrf.mxu1 }
 0x2d1   : > { %1620 = vst [vmem:[%s4930_s26 + $0x90] sm:$0xff] %v1548_v55  ;;  %v1540_v4 = vadd.f32 %v4923_v3, %v1539_v59 }
 0x2d2   : > { %v3618_v5 = vpop.f32.mrf.mxu1 }
 0x2d3   : > { %1618 = vst [vmem:[%s4930_s26 + $0x80] sm:$0xff] %v1540_v4  ;;  %v1551_v10 = vadd.f32 %v3618_v5, %v4923_v3 }
 0x2d4   : > { %v1542_v12 = vpop.f32.mrf.mxu1 }
 0x2d5   : > { %1621 = vst [vmem:[%s4930_s26 + $0x98] sm:$0xff] %v1551_v10  ;;  %v1543_v18 = vadd.f32 %v4923_v3, %v1542_v12 }
 0x2d7   : > { %1619 = vst [vmem:[%s4930_s26 + $0x88] sm:$0xff] %v1543_v18 }
 0x2de   : > { %v3621_v29 = vpop.f32.mrf.mxu1 }
 0x2df   : > { %v1564_v23 = vadd.f32 %v3621_v29, %v4923_v3 }
 0x2e0   : > { %v1555_v60 = vpop.f32.mrf.mxu1 }
 0x2e1   : > { %1624 = vst [vmem:[%s4930_s26 + $0xb0] sm:$0xff] %v1564_v23  ;;  %v1556_v8 = vadd.f32 %v4923_v3, %v1555_v60 }
 0x2e2   : > { %v3622_v14 = vpop.f32.mrf.mxu1 }
 0x2e3   : > { %1622 = vst [vmem:[%s4930_s26 + $0xa0] sm:$0xff] %v1556_v8  ;;  %v1567_v25 = vadd.f32 %v3622_v14, %v4923_v3 }
 0x2e4   : > { %v1558_v35 = vpop.f32.mrf.mxu1 }
 0x2e5   : > { %1625 = vst [vmem:[%s4930_s26 + $0xb8] sm:$0xff] %v1567_v25  ;;  %v1559_v48 = vadd.f32 %v4923_v3, %v1558_v35 }
 0x2e7   : > { %1623 = vst [vmem:[%s4930_s26 + $0xa8] sm:$0xff] %v1559_v48 }
 0x2ee   : > { %v3625_v30 = vpop.f32.mrf.mxu1 }
 0x2ef   : > { %v1580_v32 = vadd.f32 %v3625_v30, %v4923_v3 }
 0x2f0   : > { %v1571_v34 = vpop.f32.mrf.mxu1 }
 0x2f1   : > { %1628 = vst [vmem:[%s4930_s26 + $0xd0] sm:$0xff] %v1580_v32  ;;  %v1572_v37 = vadd.f32 %v4923_v3, %v1571_v34 }
 0x2f2   : > { %v3626_v39 = vpop.f32.mrf.mxu1 }
 0x2f3   : > { %1626 = vst [vmem:[%s4930_s26 + $0xc0] sm:$0xff] %v1572_v37  ;;  %v1583_v43 = vadd.f32 %v3626_v39, %v4923_v3 }
 0x2f4   : > { %v1574_v45 = vpop.f32.mrf.mxu1 }
 0x2f5   : > { %1629 = vst [vmem:[%s4930_s26 + $0xd8] sm:$0xff] %v1583_v43  ;;  %v1575_v46 = vadd.f32 %v4923_v3, %v1574_v45 }
 0x2f7   : > { %1627 = vst [vmem:[%s4930_s26 + $0xc8] sm:$0xff] %v1575_v46 }
 0x2fe   : > { %v3629_v49 = vpop.f32.mrf.mxu1 }
 0x2ff   : > { %v1596_v62 = vadd.f32 %v3629_v49, %v4923_v3 }
 0x300   : > { %v1587_v2 = vpop.f32.mrf.mxu1 }
 0x301   : > { %1632 = vst [vmem:[%s4930_s26 + $0xf0] sm:$0xff] %v1596_v62  ;;  %v1588_v33 = vadd.f32 %v4923_v3, %v1587_v2 }
 0x302   : > { %v3630_v56 = vpop.f32.mrf.mxu1 }
 0x303   : > { %1630 = vst [vmem:[%s4930_s26 + $0xe0] sm:$0xff] %v1588_v33  ;;  %v1599_v26 = vadd.f32 %v3630_v56, %v4923_v3 }
 0x304   : > { %v1590_v52 = vpop.f32.mrf.mxu1 }
 0x305   : > { %1633 = vst [vmem:[%s4930_s26 + $0xf8] sm:$0xff] %v1599_v26  ;;  %v1591_v9 = vadd.f32 %v4923_v3, %v1590_v52  ;;  %v5430_v52 = vld [vmem:[#allocation15_spill] sm:$0xff] }
 0x306   : > { %v3729_v21 = vpop.f32.mrf.mxu1 }
 0x307   : > { %1631 = vst [vmem:[%s4930_s26 + $0xe8] sm:$0xff] %v1591_v9  ;;  %v2344_v41 = vadd.f32 %v3729_v21, %v4505_v58  ;;  %v5431_v21 = vld [vmem:[#allocation16_spill] sm:$0xff] }
 0x308   : > { %v2215_v15 = vpop.f32.mrf.mxu1 }
 0x309   : > { %v2342_v13 = vadd.f32 %v2215_v15, %v4488_v44  ;;  %v2383_v57 = vadd.f32 %v5043_v38, %v2344_v41 }
 0x30a   : > { %v3730_v7 = vpop.f32.mrf.mxu1 }
 0x30b   : > { %v2345_v20 = vadd.f32 %v3730_v7, %v4513_v0  ;;  %v2381_v63 = vadd.f32 %v5043_v38, %v2342_v13  ;;  %v2415_v5 = vmax.f32 %v2383_v57, 0.0 }
 0x30c   : > { %v2218_v61 = vpop.f32.mrf.mxu1 }
 0x30d   : > { %v2384_v3 = vadd.f32 %v5043_v38, %v2345_v20  ;;  %v2343_v53 = vadd.f32 %v2218_v61, %v4499_v51  ;;  %v2413_v55 = vmax.f32 %v2381_v63, 0.0  ;;  %v5432_v61 = vld [vmem:[#allocation14_spill] sm:$0xff] }
 0x30e   : > { %v3733_v44 = vpop.f32.mrf.mxu1 }
 0x30f   : > { %v2382_v58 = vadd.f32 %v5043_v38, %v2343_v53  ;;  %v2416_v50 = vmax.f32 %v2384_v3, 0.0  ;;  %v2348_v0 = vadd.f32 %v3733_v44, %v4531_v17 }
 0x310   : > { %v2231_v42 = vpop.f32.mrf.mxu1 }
 0x311   : > { %v2414_v59 = vmax.f32 %v2382_v58, 0.0  ;;  %v2346_v4 = vadd.f32 %v2231_v42, %v4519_v6  ;;  %v2446_v29 = vpack.c.bf16 %v2416_v50, %v2415_v5  ;;  %v2387_v14 = vadd.f32 %v5043_v38, %v2348_v0  ;;  %v5433_v50 = vld [vmem:[#allocation17_spill] sm:$0xff]  ;;  %v5435_v0 = vld [vmem:[#allocation20_spill] sm:$0xff] }
 0x312   : > { %v3734_v10 = vpop.f32.mrf.mxu1 }
 0x313   : > { %v2349_v12 = vadd.f32 %v3734_v10, %v4538_v22  ;;  %v2445_v18 = vpack.c.bf16 %v2414_v59, %v2413_v55  ;;  %v2385_v23 = vadd.f32 %v5043_v38, %v2346_v4  ;;  %v2419_v32 = vmax.f32 %v2387_v14, 0.0  ;;  %v5434_v59 = vld [vmem:[#allocation19_spill] sm:$0xff] }
 0x314   : > { %v2234_v51 = vpop.f32.mrf.mxu1 }
 0x315   : > { %v2388_v60 = vadd.f32 %v5043_v38, %v2349_v12  ;;  %v2347_v8 = vadd.f32 %v2234_v51, %v4526_v11  ;;  %3775 = vmatprep.mubr.bf16.mxu0 %v2445_v18  ;;  %v2417_v35 = vmax.f32 %v2385_v23, 0.0  ;;  %v5436_v23 = vld [vmem:[#allocation18_spill] sm:$0xff] }
 0x316   : > { %v3737_v25 = vpop.f32.mrf.mxu1  ;;  %3776 = vmatmul.mubr.bf16.vlgmr.msra.gmra.mxu0 %v2446_v29 }
 0x317   : > { %v2386_v6 = vadd.f32 %v5043_v38, %v2347_v8  ;;  %3808 = vmatpush3.bf16.msra.mxu0 %v4966_v54  ;;  %v2420_v17 = vmax.f32 %v2388_v60, 0.0  ;;  %v2352_v11 = vadd.f32 %v3737_v25, %v4546_v36 }
 0x318   : > { %v2247_v22 = vpop.f32.mrf.mxu1  ;;  %3809 = vmatprep.subr.bf16.mxu0 %v4973_v1 }
 0x319   : > { %v2418_v48 = vmax.f32 %v2386_v6, 0.0  ;;  %v2350_v30 = vadd.f32 %v2247_v22, %v4540_v27  ;;  %v2448_v45 = vpack.c.bf16 %v2420_v17, %v2419_v32  ;;  %v2391_v27 = vadd.f32 %v5043_v38, %v2352_v11  ;;  %v5438_v32 = vld [vmem:[#allocation23_spill] sm:$0xff] }
 0x31a   : > { %v3738_v34 = vpop.f32.mrf.mxu1 }
 0x31b   : > { %v2353_v37 = vadd.f32 %v3738_v34, %v4550_v40  ;;  %v2447_v39 = vpack.c.bf16 %v2418_v48, %v2417_v35  ;;  %3810 = vmatpush3.bf16.msra.mxu0 %v4973_v1  ;;  %v2389_v54 = vadd.f32 %v5043_v38, %v2350_v30  ;;  %v2423_v26 = vmax.f32 %v2391_v27, 0.0  ;;  %v5440_v27 = vld [vmem:[#allocation22_spill] sm:$0xff] }
 0x31c   : > { %v2250_v43 = vpop.f32.mrf.mxu1  ;;  %3811 = vmatprep.subr.bf16.mxu0 %v4985_v16 }
 0x31d   : > { %v2392_v46 = vadd.f32 %v5043_v38, %v2353_v37  ;;  %v2351_v49 = vadd.f32 %v2250_v43, %v4544_v31  ;;  %3779 = vmatprep.mubr.bf16.mxu0 %v2447_v39  ;;  %v2421_v2 = vmax.f32 %v2389_v54, 0.0  ;;  %v5439_v37 = vld [vmem:[#allocation24_spill] sm:$0xff] }
 0x31e   : > { %v3741_v36 = vpop.f32.mrf.mxu1  ;;  %3780 = vmatmul.mubr.bf16.gmra.mxu0 %v2448_v45 }
 0x31f   : > { %v2390_v40 = vadd.f32 %v5043_v38, %v2351_v49  ;;  %3812 = vmatpush3.bf16.msra.mxu0 %v4985_v16  ;;  %v2424_v1 = vmax.f32 %v2392_v46, 0.0  ;;  %v2356_v31 = vadd.f32 %v3741_v36, %v5430_v52  ;;  %v5441_v52 = vld [vmem:[#allocation25_spill] sm:$0xff] }
 0x320   : > { %v2263_v62 = vpop.f32.mrf.mxu1  ;;  %3813 = vmatprep.subr.bf16.mxu0 %v4995_v19 }
 0x321   : > { %v2422_v33 = vmax.f32 %v2390_v40, 0.0  ;;  %v2354_v56 = vadd.f32 %v2263_v62, %v4552_v47  ;;  %v2450_v7 = vpack.c.bf16 %v2424_v1, %v2423_v26  ;;  %v2395_v47 = vadd.f32 %v5043_v38, %v2356_v31 }
 0x322   : > { %v3742_v9 = vpop.f32.mrf.mxu1 }
 0x323   : > { %v2357_v15 = vadd.f32 %v3742_v9, %v5431_v21  ;;  %v2449_v13 = vpack.c.bf16 %v2422_v33, %v2421_v2  ;;  %3814 = vmatpush3.bf16.msra.mxu0 %v4995_v19  ;;  %v2393_v16 = vadd.f32 %v5043_v38, %v2354_v56  ;;  %v2427_v55 = vmax.f32 %v2395_v47, 0.0  ;;  %v5442_v21 = vld [vmem:[#allocation27_spill] sm:$0xff] }
 0x324   : > { %v2266_v41 = vpop.f32.mrf.mxu1  ;;  %3815 = vmatprep.subr.bf16.mxu0 %v5002_v24 }
 0x325   : > { %v2396_v20 = vadd.f32 %v5043_v38, %v2357_v15  ;;  %v2355_v63 = vadd.f32 %v2266_v41, %v5432_v61  ;;  %3783 = vmatprep.mubr.bf16.mxu0 %v2449_v13  ;;  %v2425_v44 = vmax.f32 %v2393_v16, 0.0  ;;  %v5443_v41 = vld [vmem:[#allocation28_spill] sm:$0xff] }
 0x326   : > { %v3745_v3 = vpop.f32.mrf.mxu1  ;;  %3784 = vmatmul.mubr.bf16.gmra.mxu0 %v2450_v7 }
 0x327   : > { %v2394_v53 = vadd.f32 %v5043_v38, %v2355_v63  ;;  %3816 = vmatpush3.bf16.msra.mxu0 %v5002_v24  ;;  %v2428_v19 = vmax.f32 %v2396_v20, 0.0  ;;  %v2360_v4 = vadd.f32 %v3745_v3, %v5434_v59  ;;  %v5444_v3 = vld [vmem:[#allocation26_spill] sm:$0xff]  ;;  %v5445_v59 = vld [vmem:[#allocation29_spill] sm:$0xff] }
 0x328   : > { %v2279_v57 = vpop.f32.mrf.mxu1  ;;  %3817 = vmatprep.subr.bf16.mxu0 %v5010_v28 }
 0x329   : > { %v2426_v58 = vmax.f32 %v2394_v53, 0.0  ;;  %v2358_v42 = vadd.f32 %v2279_v57, %v5433_v50  ;;  %v2452_v29 = vpack.c.bf16 %v2428_v19, %v2427_v55  ;;  %v2399_v8 = vadd.f32 %v5043_v38, %v2360_v4 }
 0x32a   : > { %v3746_v5 = vpop.f32.mrf.mxu1 }
 0x32b   : > { %v2361_v10 = vadd.f32 %v3746_v5, %v5435_v0  ;;  %v2451_v12 = vpack.c.bf16 %v2426_v58, %v2425_v44  ;;  %3818 = vmatpush3.bf16.msra.mxu0 %v5010_v28  ;;  %v2397_v24 = vadd.f32 %v5043_v38, %v2358_v42  ;;  %v5437_v28 = vld [vmem:[#allocation21_spill] sm:$0xff]  ;;  %v2431_v30 = vmax.f32 %v2399_v8, 0.0  ;;  %v5446_v0 = vld [vmem:[#allocation31_spill] sm:$0xff] }
 0x32c   : > { %v2282_v18 = vpop.f32.mrf.mxu1 }
 0x32d   : > { %v2400_v51 = vadd.f32 %v5043_v38, %v2361_v10  ;;  %v2359_v60 = vadd.f32 %v2282_v18, %v5436_v23  ;;  %3787 = vmatprep.mubr.bf16.mxu0 %v2451_v12  ;;  %v2429_v22 = vmax.f32 %v2397_v24, 0.0  ;;  %v5447_v18 = vld [vmem:[#allocation32_spill] sm:$0xff] }
 0x32e   : > { %v3749_v14 = vpop.f32.mrf.mxu1  ;;  %3788 = vmatmul.mubr.bf16.gmra.mxu0 %v2452_v29 }
 0x32f   : > { %v2398_v25 = vadd.f32 %v5043_v38, %v2359_v60  ;;  %v2432_v6 = vmax.f32 %v2400_v51, 0.0  ;;  %v2364_v11 = vadd.f32 %v3749_v14, %v5438_v32  ;;  %v5448_v14 = vld [vmem:[#allocation30_spill] sm:$0xff] }
 0x330   : > { %v2295_v17 = vpop.f32.mrf.mxu1 }
 0x331   : > { %v2430_v35 = vmax.f32 %v2398_v25, 0.0  ;;  %v2362_v48 = vadd.f32 %v2295_v17, %v5437_v28  ;;  %v2454_v45 = vpack.c.bf16 %v2432_v6, %v2431_v30  ;;  %v2403_v40 = vadd.f32 %v5043_v38, %v2364_v11  ;;  %v3986_v11 = vld [vmem:[%s5365_s13 + $0x8] sm:$0xff]  }
 0x332   : > { %v3750_v34 = vpop.f32.mrf.mxu1  ;;  %3861 = vmatprep.subr.bf16.mxu1 %v3986_v11  ;;  %3819 = vmatprep.subr.bf16.mxu0 %v3986_v11 }
 0x333   : > { %v2365_v39 = vadd.f32 %v3750_v34, %v5439_v37  ;;  %v2453_v43 = vpack.c.bf16 %v2430_v35, %v2429_v22  ;;  %v2401_v46 = vadd.f32 %v5043_v38, %v2362_v48  ;;  %v2435_v9 = vmax.f32 %v2403_v40, 0.0  ;;  %3869 = vmatpush3.bf16.msra.mxu1 %v3986_v11  ;;  %3820 = vmatpush3.bf16.msra.mxu0 %v3986_v11 }
 0x334   : > { %v2298_v54 = vpop.f32.mrf.mxu1 }
 0x335   : > { %v2404_v49 = vadd.f32 %v5043_v38, %v2365_v39  ;;  %v2363_v36 = vadd.f32 %v2298_v54, %v5440_v27  ;;  %3791 = vmatprep.mubr.bf16.mxu0 %v2453_v43  ;;  %v2433_v56 = vmax.f32 %v2401_v46, 0.0  ;;  %v5127_v39 = vld [vmem:[%s5364_s12] ss:$0 sm:$0xff] }
 0x336   : > { %v3753_v1 = vpop.f32.mrf.mxu1  ;;  %3792 = vmatmul.mubr.bf16.gmra.mxu0 %v2454_v45 }
 0x337   : > { %v2402_v62 = vadd.f32 %v5043_v38, %v2363_v36  ;;  %v2436_v2 = vmax.f32 %v2404_v49, 0.0  ;;  %v2368_v15 = vadd.f32 %v3753_v1, %v5442_v21 }
 0x338   : > { %v2311_v33 = vpop.f32.mrf.mxu1 }
 0x339   : > { %v2434_v26 = vmax.f32 %v2402_v62, 0.0  ;;  %v2366_v31 = vadd.f32 %v2311_v33, %v5441_v52  ;;  %v2456_v20 = vpack.c.bf16 %v2436_v2, %v2435_v9  ;;  %v2407_v19 = vadd.f32 %v5043_v38, %v2368_v15 }
 0x33a   : > { %v3754_v13 = vpop.f32.mrf.mxu1 }
 0x33b   : > { %v2369_v7 = vadd.f32 %v3754_v13, %v5443_v41  ;;  %v2455_v16 = vpack.c.bf16 %v2434_v26, %v2433_v56  ;;  %v2405_v63 = vadd.f32 %v5043_v38, %v2366_v31  ;;  %v2439_v5 = vmax.f32 %v2407_v19, 0.0 }
 0x33c   : > { %v2314_v61 = vpop.f32.mrf.mxu1 }
 0x33d   : > { %v2408_v47 = vadd.f32 %v5043_v38, %v2369_v7  ;;  %v2367_v53 = vadd.f32 %v2314_v61, %v5444_v3  ;;  %3795 = vmatprep.mubr.bf16.mxu0 %v2455_v16  ;;  %v2437_v42 = vmax.f32 %v2405_v63, 0.0 }
 0x33e   : > { %v3757_v57 = vpop.f32.mrf.mxu1  ;;  %3796 = vmatmul.mubr.bf16.gmra.mxu0 %v2456_v20 }
 0x33f   : > { %v2406_v44 = vadd.f32 %v5043_v38, %v2367_v53  ;;  %v2440_v58 = vmax.f32 %v2408_v47, 0.0  ;;  %v2372_v10 = vadd.f32 %v3757_v57, %v5446_v0 }
 0x340   : > { %v2327_v50 = vpop.f32.mrf.mxu1 }
 0x341   : > { %v2438_v55 = vmax.f32 %v2406_v44, 0.0  ;;  %v2370_v4 = vadd.f32 %v2327_v50, %v5445_v59  ;;  %v2458_v51 = vpack.c.bf16 %v2440_v58, %v2439_v5  ;;  %v2411_v6 = vadd.f32 %v5043_v38, %v2372_v10 }
 0x342   : > { %v3758_v12 = vpop.f32.mrf.mxu1 }
 0x343   : > { %v2373_v29 = vadd.f32 %v3758_v12, %v5447_v18  ;;  %v2457_v24 = vpack.c.bf16 %v2438_v55, %v2437_v42  ;;  %v2409_v60 = vadd.f32 %v5043_v38, %v2370_v4  ;;  %v2443_v48 = vmax.f32 %v2411_v6, 0.0 }
 0x344   : > { %v2330_v23 = vpop.f32.mrf.mxu1 }
 0x345   : > { %v2412_v8 = vadd.f32 %v5043_v38, %v2373_v29  ;;  %v2371_v25 = vadd.f32 %v2330_v23, %v5448_v14  ;;  %3799 = vmatprep.mubr.bf16.mxu0 %v2457_v24  ;;  %v2441_v35 = vmax.f32 %v2409_v60, 0.0 }
 0x346   : > { %3800 = vmatmul.mubr.bf16.gmra.mxu0 %v2458_v51 }
 0x347   : > { %v2410_v17 = vadd.f32 %v5043_v38, %v2371_v25  ;;  %v2444_v22 = vmax.f32 %v2412_v8, 0.0  ;;  %v3987_v38 = vld [vmem:[%s5365_s13] sm:$0xff]  }
 0x348   : > { %3821 = vmatprep.subr.bf16.mxu0 %v3987_v38  ;;  %3862 = vmatprep.subr.bf16.mxu1 %v3987_v38 }
 0x349   : > { %v2442_v28 = vmax.f32 %v2410_v17, 0.0  ;;  %v2460_v32 = vpack.c.bf16 %v2444_v22, %v2443_v48  ;;  %3822 = vmatpush3.bf16.msra.mxu0 %v3987_v38  ;;  %3870 = vmatpush3.bf16.msra.mxu1 %v3987_v38 }
 0x34b   : > { %v2459_v30 = vpack.c.bf16 %v2442_v28, %v2441_v35 }
 0x34d   : > { %3803 = vmatprep.mubr.bf16.mxu0 %v2459_v30 }
 0x34e   : > { %3804 = vmatmul.mubr.bf16.gmra.mxu0 %v2460_v32 }
 0x3d6   : > { %v3777_v34 = vpop.f32.mrf.mxu0 }
 0x3d7   : > { %v2575_v46 = vadd.f32 %v3777_v34, %v5127_v39 }
 0x3d8   : > { %v2566_v37 = vpop.f32.mrf.mxu0 }
 0x3d9   : > { %v2567_v45 = vadd.f32 %v5127_v39, %v2566_v37  ;;  %v2695_v2 = vmax.f32 %v2575_v46, 0.0 }
 0x3da   : > { %v3778_v43 = vpop.f32.mrf.mxu0 }
 0x3db   : > { %v2578_v54 = vadd.f32 %v3778_v43, %v5127_v39  ;;  %v2693_v1 = vmax.f32 %v2567_v45, 0.0 }
 0x3dc   : > { %v2569_v49 = vpop.f32.mrf.mxu0 }
 0x3dd   : > { %v2570_v27 = vadd.f32 %v5127_v39, %v2569_v49  ;;  %v2696_v36 = vmax.f32 %v2578_v54, 0.0 }
 0x3de   : > { %v3781_v40 = vpop.f32.mrf.mxu0 }
 0x3df   : > { %v2694_v62 = vmax.f32 %v2570_v27, 0.0  ;;  %v2726_v26 = vpack.c.bf16 %v2696_v36, %v2695_v2  ;;  %v2591_v21 = vadd.f32 %v3781_v40, %v5127_v39 }
 0x3e0   : > { %v2582_v33 = vpop.f32.mrf.mxu0 }
 0x3e1   : > { %v2725_v56 = vpack.c.bf16 %v2694_v62, %v2693_v1  ;;  %v2583_v31 = vadd.f32 %v5127_v39, %v2582_v33  ;;  %v2699_v61 = vmax.f32 %v2591_v21, 0.0 }
 0x3e2   : > { %v3782_v52 = vpop.f32.mrf.mxu0 }
 0x3e3   : > { %v2594_v9 = vadd.f32 %v3782_v52, %v5127_v39  ;;  %3823 = vmatprep.mubr.bf16.mxu0 %v2725_v56  ;;  %v2697_v16 = vmax.f32 %v2583_v31, 0.0 }
 0x3e4   : > { %v2585_v15 = vpop.f32.mrf.mxu0  ;;  %3824 = vmatmul.mubr.bf16.vlgmr.msra.gmra.mxu0 %v2726_v26 }
 0x3e5   : > { %v2586_v13 = vadd.f32 %v5127_v39, %v2585_v15  ;;  %v2700_v41 = vmax.f32 %v2594_v9, 0.0 }
 0x3e6   : > { %v3785_v7 = vpop.f32.mrf.mxu0 }
 0x3e7   : > { %v2698_v20 = vmax.f32 %v2586_v13, 0.0  ;;  %v2728_v3 = vpack.c.bf16 %v2700_v41, %v2699_v61  ;;  %v2607_v44 = vadd.f32 %v3785_v7, %v5127_v39 }
 0x3e8   : > { %v2598_v63 = vpop.f32.mrf.mxu0 }
 0x3e9   : > { %v2727_v47 = vpack.c.bf16 %v2698_v20, %v2697_v16  ;;  %v2599_v19 = vadd.f32 %v5127_v39, %v2598_v63  ;;  %v2703_v5 = vmax.f32 %v2607_v44, 0.0 }
 0x3ea   : > { %v3786_v53 = vpop.f32.mrf.mxu0 }
 0x3eb   : > { %v2610_v57 = vadd.f32 %v3786_v53, %v5127_v39  ;;  %3827 = vmatprep.mubr.bf16.mxu1 %v2727_v47  ;;  %v2701_v59 = vmax.f32 %v2599_v19, 0.0 }
 0x3ec   : > { %v2601_v58 = vpop.f32.mrf.mxu0  ;;  %3828 = vmatmul.mubr.bf16.vlgmr.msra.gmra.mxu1 %v2728_v3 }
 0x3ed   : > { %v2602_v50 = vadd.f32 %v5127_v39, %v2601_v58  ;;  %v2704_v42 = vmax.f32 %v2610_v57, 0.0 }
 0x3ee   : > { %v3789_v55 = vpop.f32.mrf.mxu0 }
 0x3ef   : > { %v2702_v4 = vmax.f32 %v2602_v50, 0.0  ;;  %v2730_v12 = vpack.c.bf16 %v2704_v42, %v2703_v5  ;;  %v2623_v51 = vadd.f32 %v3789_v55, %v5127_v39 }
 0x3f0   : > { %v2614_v0 = vpop.f32.mrf.mxu0 }
 0x3f1   : > { %v2729_v10 = vpack.c.bf16 %v2702_v4, %v2701_v59  ;;  %v2615_v29 = vadd.f32 %v5127_v39, %v2614_v0  ;;  %v2707_v17 = vmax.f32 %v2623_v51, 0.0 }
 0x3f2   : > { %v3790_v18 = vpop.f32.mrf.mxu0 }
 0x3f3   : > { %v2626_v24 = vadd.f32 %v3790_v18, %v5127_v39  ;;  %3831 = vmatprep.mubr.bf16.mxu1 %v2729_v10  ;;  %v2705_v25 = vmax.f32 %v2615_v29, 0.0 }
 0x3f4   : > { %v2617_v23 = vpop.f32.mrf.mxu0  ;;  %3832 = vmatmul.mubr.bf16.gmra.mxu1 %v2730_v12 }
 0x3f5   : > { %v2618_v60 = vadd.f32 %v5127_v39, %v2617_v23  ;;  %v2708_v8 = vmax.f32 %v2626_v24, 0.0 }
 0x3f6   : > { %v3793_v14 = vpop.f32.mrf.mxu0 }
 0x3f7   : > { %v2706_v6 = vmax.f32 %v2618_v60, 0.0  ;;  %v2732_v28 = vpack.c.bf16 %v2708_v8, %v2707_v17  ;;  %v2639_v11 = vadd.f32 %v3793_v14, %v5127_v39 }
 0x3f8   : > { %v2630_v22 = vpop.f32.mrf.mxu0 }
 0x3f9   : > { %v2731_v35 = vpack.c.bf16 %v2706_v6, %v2705_v25  ;;  %v2631_v30 = vadd.f32 %v5127_v39, %v2630_v22  ;;  %v2711_v46 = vmax.f32 %v2639_v11, 0.0 }
 0x3fa   : > { %v3794_v48 = vpop.f32.mrf.mxu0 }
 0x3fb   : > { %v2642_v32 = vadd.f32 %v3794_v48, %v5127_v39  ;;  %3835 = vmatprep.mubr.bf16.mxu1 %v2731_v35  ;;  %v2709_v45 = vmax.f32 %v2631_v30, 0.0 }
 0x3fc   : > { %v2633_v38 = vpop.f32.mrf.mxu0  ;;  %3836 = vmatmul.mubr.bf16.gmra.mxu1 %v2732_v28 }
 0x3fd   : > { %v2634_v34 = vadd.f32 %v5127_v39, %v2633_v38  ;;  %v2712_v37 = vmax.f32 %v2642_v32, 0.0 }
 0x3fe   : > { %v3797_v43 = vpop.f32.mrf.mxu0 }
 0x3ff   : > { %v2710_v54 = vmax.f32 %v2634_v34, 0.0  ;;  %v2734_v36 = vpack.c.bf16 %v2712_v37, %v2711_v46  ;;  %v2655_v2 = vadd.f32 %v3797_v43, %v5127_v39 }
 0x400   : > { %v2646_v49 = vpop.f32.mrf.mxu0 }
 0x401   : > { %v2733_v27 = vpack.c.bf16 %v2710_v54, %v2709_v45  ;;  %v2647_v1 = vadd.f32 %v5127_v39, %v2646_v49  ;;  %v2715_v21 = vmax.f32 %v2655_v2, 0.0 }
 0x402   : > { %v3798_v40 = vpop.f32.mrf.mxu0 }
 0x403   : > { %v2658_v62 = vadd.f32 %v3798_v40, %v5127_v39  ;;  %3839 = vmatprep.mubr.bf16.mxu1 %v2733_v27  ;;  %v2713_v31 = vmax.f32 %v2647_v1, 0.0 }
 0x404   : > { %v2649_v33 = vpop.f32.mrf.mxu0  ;;  %3840 = vmatmul.mubr.bf16.gmra.mxu1 %v2734_v36 }
 0x405   : > { %v2650_v56 = vadd.f32 %v5127_v39, %v2649_v33  ;;  %v2716_v26 = vmax.f32 %v2658_v62, 0.0 }
 0x406   : > { %v3801_v52 = vpop.f32.mrf.mxu0 }
 0x407   : > { %v2714_v9 = vmax.f32 %v2650_v56, 0.0  ;;  %v2736_v41 = vpack.c.bf16 %v2716_v26, %v2715_v21  ;;  %v2671_v61 = vadd.f32 %v3801_v52, %v5127_v39 }
 0x408   : > { %v2662_v15 = vpop.f32.mrf.mxu0 }
 0x409   : > { %v2735_v13 = vpack.c.bf16 %v2714_v9, %v2713_v31  ;;  %v2663_v16 = vadd.f32 %v5127_v39, %v2662_v15  ;;  %v2719_v44 = vmax.f32 %v2671_v61, 0.0 }
 0x40a   : > { %v3802_v7 = vpop.f32.mrf.mxu0 }
 0x40b   : > { %v2674_v20 = vadd.f32 %v3802_v7, %v5127_v39  ;;  %3843 = vmatprep.mubr.bf16.mxu1 %v2735_v13  ;;  %v2717_v19 = vmax.f32 %v2663_v16, 0.0 }
 0x40c   : > { %v2665_v63 = vpop.f32.mrf.mxu0  ;;  %3844 = vmatmul.mubr.bf16.gmra.mxu1 %v2736_v41 }
 0x40d   : > { %v2666_v47 = vadd.f32 %v5127_v39, %v2665_v63  ;;  %v2720_v3 = vmax.f32 %v2674_v20, 0.0 }
 0x40e   : > { %v3805_v53 = vpop.f32.mrf.mxu0 }
 0x40f   : > { %v2718_v57 = vmax.f32 %v2666_v47, 0.0  ;;  %v2738_v42 = vpack.c.bf16 %v2720_v3, %v2719_v44  ;;  %v2687_v5 = vadd.f32 %v3805_v53, %v5127_v39 }
 0x410   : > { %v2678_v58 = vpop.f32.mrf.mxu0 }
 0x411   : > { %v2737_v50 = vpack.c.bf16 %v2718_v57, %v2717_v19  ;;  %v2679_v59 = vadd.f32 %v5127_v39, %v2678_v58  ;;  %v2723_v24 = vmax.f32 %v2687_v5, 0.0 }
 0x412   : > { %v3806_v55 = vpop.f32.mrf.mxu0 }
 0x413   : > { %v2690_v4 = vadd.f32 %v3806_v55, %v5127_v39  ;;  %3847 = vmatprep.mubr.bf16.mxu1 %v2737_v50  ;;  %v2721_v18 = vmax.f32 %v2679_v59, 0.0 }
 0x414   : > { %v2681_v0 = vpop.f32.mrf.mxu0  ;;  %3848 = vmatmul.mubr.bf16.gmra.mxu1 %v2738_v42 }
 0x415   : > { %v2682_v10 = vadd.f32 %v5127_v39, %v2681_v0  ;;  %v2724_v12 = vmax.f32 %v2690_v4, 0.0 }
 0x417   : > { %v2722_v29 = vmax.f32 %v2682_v10, 0.0  ;;  %v2740_v23 = vpack.c.bf16 %v2724_v12, %v2723_v24 }
 0x419   : > { %v2739_v51 = vpack.c.bf16 %v2722_v29, %v2721_v18 }
 0x41b   : > { %3851 = vmatprep.mubr.bf16.mxu1 %v2739_v51 }
 0x41c   : > { %3852 = vmatmul.mubr.bf16.gmra.mxu1 %v2740_v23 }
 0x41d   : > { %4001 = shalt.err (!%p3998_p3)
}
 0x41e   : > { %s4002_s26 = scalar_lea.hbm %s5169_s21, 4096  ;;  %s4006_s23 = scalar_lea.hbm %s5368_s16, 8192 }
 0x41f   : > { %p4003_p4 = scmp.ne.s32.totalorder %s5169_s21, %s4002_s26  ;;  %p4007_p9 = scmp.lt.s32.totalorder %s5169_s21, %s5368_s16 }
 0x420   : > { %p4008_p10 = scmp.lt.s32.totalorder %s4006_s23, %s4002_s26 }
 0x421   : > { %p4004_p7 = pnand %p4003_p4, %p4243_p5 }
 0x422   : > { %p4009_p11 = por %p4008_p10, %p4007_p9 }
 0x423   : > { %p4005_p8 = pneg %p4004_p7 }
 0x425   : > { %p4010_p12 = pnand %p4009_p11, %p4005_p8 }
 0x427   : > { %4013 = shalt.err (!%p4010_p12)
}
 0x428   : > { %s4109_s2 = smov 128   ;;  %s4110_s19 = smov 8  }
 0x429   : > { %3872 = dma.vmem_to_hbm [thread:$0]  (%p4243_p5), %s5172_s0, 4096, %s5169_s21, %s5174_s22, %s4109_s2, %s4109_s2, %s4110_s19  }
 0x42a   : > { %s5204_s26 = scalar_lea.hbm %s5369_s17, %s5163_s30  ;;  %s3061_s20 = sshll.u32 %s4629_s24, 4  ;;  %s3062_s20 = int_to_ptr.vmem [resolvable:$true] %s3061_s20 }
 0x42b   : > { %s4014_s18 = scalar_lea.vmem %s3062_s20, 4096  ;;  %s4111_s23 = smov [#allocation6]  }
 0x42c   : > { %p4015_p13 = scmp.ne.s32.totalorder %s3062_s20, %s4014_s18  ;;  %s4018_s28 = sshll.u32 %s4111_s23, 4  ;;  %s4019_s28 = int_to_ptr.vmem [resolvable:$false] %s4018_s28 }
 0x42d   : > { %s4020_s5 = scalar_lea.vmem %s4019_s28, 8192  ;;  %p4021_p2 = scmp.lt.s32.totalorder %s3062_s20, %s4019_s28 }
 0x42e   : > { %p4016_p0 = pnand %p4015_p13, %p4243_p5  ;;  %p4022_p3 = scmp.lt.s32.totalorder %s4020_s5, %s4014_s18 }
 0x430   : > { %p4017_p1 = pneg %p4016_p0  ;;  %p4023_p4 = por %p4022_p3, %p4021_p2 }
 0x432   : > { %p4024_p7 = pnand %p4023_p4, %p4017_p1 }
 0x434   : > { %4027 = shalt.err (!%p4024_p7)
}
 0x435   : > { %s4028_s24 = scalar_lea.hbm %s5204_s26, 4096  ;;  %s4032_s4 = scalar_lea.hbm %s5369_s17, 8192 }
 0x436   : > { %p4029_p8 = scmp.ne.s32.totalorder %s5204_s26, %s4028_s24  ;;  %p4033_p11 = scmp.lt.s32.totalorder %s5204_s26, %s5369_s17 }
 0x437   : > { %p4034_p12 = scmp.lt.s32.totalorder %s4032_s4, %s4028_s24 }
 0x438   : > { %p4030_p9 = pnand %p4029_p8, %p4243_p5 }
 0x439   : > { %p4035_p13 = por %p4034_p12, %p4033_p11 }
 0x43a   : > { %p4031_p10 = pneg %p4030_p9 }
 0x43c   : > { %p4036_p0 = pnand %p4035_p13, %p4031_p10 }
 0x43e   : > { %4039 = shalt.err (!%p4036_p0)
}
 0x43f   : > { %3873 = dma.vmem_to_hbm [thread:$0]  (%p4243_p5), %s3062_s20, 4096, %s5204_s26, %s5174_s22, %s4109_s2, %s4109_s2, %s4110_s19  }
 0x440   : > { %v5230_v39 = vld [vmem:[%s5366_s14] ss:$0 sm:$0xff]  ;;  %s5234_s28 = scalar_lea.vmem [#allocation2], %s4624_s29  ;;  %s5303_s20 = scalar_lea.hbm %s5367_s15, %s5163_s30 }
 0x441   : > { %s3029_s29 = sshll.u32 %s5234_s28, 4  ;;  %s5449_s24 = sand.u32 1, %s4096_s25   ;;  %s5305_s29 = int_to_ptr.vmem [resolvable:$true] %s3029_s29 }
 0x442   : > { %s3006_s21 = scalar_lea.sflag [#allocation3], %s5449_s24  ;;  %s4040_s0 = scalar_lea.vmem %s5305_s29, 4096 }
 0x443   : > { %p4041_p1 = scmp.ne.s32.totalorder %s5305_s29, %s4040_s0  ;;  %s4112_s4 = smov [#allocation2]  }
 0x444   : > { %s4044_s3 = sshll.u32 %s4112_s4, 4  ;;  %s4045_s3 = int_to_ptr.vmem [resolvable:$false] %s4044_s3 }
 0x445   : > { %p4042_p2 = pnand %p4041_p1, %p4243_p5  ;;  %s4046_s23 = scalar_lea.vmem %s4045_s3, 8192 }
 0x446   : > { %p4047_p4 = scmp.lt.s32.totalorder %s5305_s29, %s4045_s3  ;;  %p4048_p7 = scmp.lt.s32.totalorder %s4046_s23, %s4040_s0 }
 0x447   : > { %p4043_p3 = pneg %p4042_p2 }
 0x448   : > { %p4049_p8 = por %p4048_p7, %p4047_p4 }
 0x44a   : > { %p4050_p9 = pnand %p4049_p8, %p4043_p3 }
 0x4a4   : > { %v3825_v60 = vpop.f32.mrf.mxu0 }
 0x4a5   : > { %v2855_v8 = vadd.f32 %v3825_v60, %v5230_v39 }
 0x4a6   : > { %v2846_v14 = vpop.f32.mrf.mxu0 }
 0x4a7   : > { %2975 = vst [vmem:[%s5234_s28 + $0x10] sm:$0xff] %v2855_v8  ;;  %v2847_v25 = vadd.f32 %v5230_v39, %v2846_v14 }
 0x4a8   : > { %v3826_v6 = vpop.f32.mrf.mxu0 }
 0x4a9   : > { %2973 = vst [vmem:[%s5234_s28] sm:$0xff] %v2847_v25  ;;  %v2858_v17 = vadd.f32 %v3826_v6, %v5230_v39 }
 0x4aa   : > { %v2849_v22 = vpop.f32.mrf.mxu0 }
 0x4ab   : > { %2976 = vst [vmem:[%s5234_s28 + $0x18] sm:$0xff] %v2858_v17  ;;  %v2850_v35 = vadd.f32 %v5230_v39, %v2849_v22 }
 0x4ac   : > { %v3829_v28 = vpop.f32.mrf.mxu1 }
 0x4ad   : > { %2974 = vst [vmem:[%s5234_s28 + $0x8] sm:$0xff] %v2850_v35  ;;  %v2871_v48 = vadd.f32 %v3829_v28, %v5230_v39 }
 0x4ae   : > { %v2862_v30 = vpop.f32.mrf.mxu1 }
 0x4af   : > { %2979 = vst [vmem:[%s5234_s28 + $0x30] sm:$0xff] %v2871_v48  ;;  %v2863_v32 = vadd.f32 %v5230_v39, %v2862_v30 }
 0x4b0   : > { %v3830_v11 = vpop.f32.mrf.mxu1 }
 0x4b1   : > { %2977 = vst [vmem:[%s5234_s28 + $0x20] sm:$0xff] %v2863_v32  ;;  %v2874_v38 = vadd.f32 %v3830_v11, %v5230_v39 }
 0x4b2   : > { %v2865_v34 = vpop.f32.mrf.mxu1 }
 0x4b3   : > { %2980 = vst [vmem:[%s5234_s28 + $0x38] sm:$0xff] %v2874_v38  ;;  %v2866_v37 = vadd.f32 %v5230_v39, %v2865_v34 }
 0x4b4   : > { %v3833_v43 = vpop.f32.mrf.mxu1 }
 0x4b5   : > { %2978 = vst [vmem:[%s5234_s28 + $0x28] sm:$0xff] %v2866_v37  ;;  %v2887_v45 = vadd.f32 %v3833_v43, %v5230_v39 }
 0x4b6   : > { %v2878_v54 = vpop.f32.mrf.mxu1 }
 0x4b7   : > { %2983 = vst [vmem:[%s5234_s28 + $0x50] sm:$0xff] %v2887_v45  ;;  %v2879_v46 = vadd.f32 %v5230_v39, %v2878_v54 }
 0x4b8   : > { %v3834_v49 = vpop.f32.mrf.mxu1 }
 0x4b9   : > { %2981 = vst [vmem:[%s5234_s28 + $0x40] sm:$0xff] %v2879_v46  ;;  %v2890_v27 = vadd.f32 %v3834_v49, %v5230_v39 }
 0x4ba   : > { %v2881_v36 = vpop.f32.mrf.mxu1 }
 0x4bb   : > { %2984 = vst [vmem:[%s5234_s28 + $0x58] sm:$0xff] %v2890_v27  ;;  %v2882_v40 = vadd.f32 %v5230_v39, %v2881_v36 }
 0x4bc   : > { %v3837_v1 = vpop.f32.mrf.mxu1 }
 0x4bd   : > { %2982 = vst [vmem:[%s5234_s28 + $0x48] sm:$0xff] %v2882_v40  ;;  %v2903_v62 = vadd.f32 %v3837_v1, %v5230_v39 }
 0x4be   : > { %v2894_v2 = vpop.f32.mrf.mxu1 }
 0x4bf   : > { %2987 = vst [vmem:[%s5234_s28 + $0x70] sm:$0xff] %v2903_v62  ;;  %v2895_v33 = vadd.f32 %v5230_v39, %v2894_v2 }
 0x4c0   : > { %v3838_v56 = vpop.f32.mrf.mxu1 }
 0x4c1   : > { %2985 = vst [vmem:[%s5234_s28 + $0x60] sm:$0xff] %v2895_v33  ;;  %v2906_v26 = vadd.f32 %v3838_v56, %v5230_v39 }
 0x4c2   : > { %v2897_v52 = vpop.f32.mrf.mxu1 }
 0x4c3   : > { %2988 = vst [vmem:[%s5234_s28 + $0x78] sm:$0xff] %v2906_v26  ;;  %v2898_v31 = vadd.f32 %v5230_v39, %v2897_v52 }
 0x4c4   : > { %v3841_v9 = vpop.f32.mrf.mxu1 }
 0x4c5   : > { %2986 = vst [vmem:[%s5234_s28 + $0x68] sm:$0xff] %v2898_v31  ;;  %v2919_v21 = vadd.f32 %v3841_v9, %v5230_v39 }
 0x4c6   : > { %v2910_v15 = vpop.f32.mrf.mxu1 }
 0x4c7   : > { %2991 = vst [vmem:[%s5234_s28 + $0x90] sm:$0xff] %v2919_v21  ;;  %v2911_v13 = vadd.f32 %v5230_v39, %v2910_v15 }
 0x4c8   : > { %v3842_v41 = vpop.f32.mrf.mxu1 }
 0x4c9   : > { %2989 = vst [vmem:[%s5234_s28 + $0x80] sm:$0xff] %v2911_v13  ;;  %v2922_v7 = vadd.f32 %v3842_v41, %v5230_v39 }
 0x4ca   : > { %v2913_v16 = vpop.f32.mrf.mxu1 }
 0x4cb   : > { %2992 = vst [vmem:[%s5234_s28 + $0x98] sm:$0xff] %v2922_v7  ;;  %v2914_v20 = vadd.f32 %v5230_v39, %v2913_v16 }
 0x4cc   : > { %v3845_v61 = vpop.f32.mrf.mxu1 }
 0x4cd   : > { %2990 = vst [vmem:[%s5234_s28 + $0x88] sm:$0xff] %v2914_v20  ;;  %v2935_v63 = vadd.f32 %v3845_v61, %v5230_v39 }
 0x4ce   : > { %v2926_v47 = vpop.f32.mrf.mxu1 }
 0x4cf   : > { %2995 = vst [vmem:[%s5234_s28 + $0xb0] sm:$0xff] %v2935_v63  ;;  %v2927_v3 = vadd.f32 %v5230_v39, %v2926_v47 }
 0x4d0   : > { %v3846_v53 = vpop.f32.mrf.mxu1 }
 0x4d1   : > { %2993 = vst [vmem:[%s5234_s28 + $0xa0] sm:$0xff] %v2927_v3  ;;  %v2938_v19 = vadd.f32 %v3846_v53, %v5230_v39 }
 0x4d2   : > { %v2929_v57 = vpop.f32.mrf.mxu1 }
 0x4d3   : > { %2996 = vst [vmem:[%s5234_s28 + $0xb8] sm:$0xff] %v2938_v19  ;;  %v2930_v44 = vadd.f32 %v5230_v39, %v2929_v57 }
 0x4d4   : > { %v3849_v58 = vpop.f32.mrf.mxu1 }
 0x4d5   : > { %2994 = vst [vmem:[%s5234_s28 + $0xa8] sm:$0xff] %v2930_v44  ;;  %v2951_v50 = vadd.f32 %v3849_v58, %v5230_v39 }
 0x4d6   : > { %v2942_v42 = vpop.f32.mrf.mxu1 }
 0x4d7   : > { %2999 = vst [vmem:[%s5234_s28 + $0xd0] sm:$0xff] %v2951_v50  ;;  %v2943_v55 = vadd.f32 %v5230_v39, %v2942_v42 }
 0x4d8   : > { %v3850_v59 = vpop.f32.mrf.mxu1 }
 0x4d9   : > { %2997 = vst [vmem:[%s5234_s28 + $0xc0] sm:$0xff] %v2943_v55  ;;  %v2954_v4 = vadd.f32 %v3850_v59, %v5230_v39 }
 0x4da   : > { %v2945_v5 = vpop.f32.mrf.mxu1 }
 0x4db   : > { %3000 = vst [vmem:[%s5234_s28 + $0xd8] sm:$0xff] %v2954_v4  ;;  %v2946_v0 = vadd.f32 %v5230_v39, %v2945_v5 }
 0x4dc   : > { %v3853_v10 = vpop.f32.mrf.mxu1 }
 0x4dd   : > { %2998 = vst [vmem:[%s5234_s28 + $0xc8] sm:$0xff] %v2946_v0  ;;  %v2967_v12 = vadd.f32 %v3853_v10, %v5230_v39 }
 0x4de   : > { %v2958_v18 = vpop.f32.mrf.mxu1 }
 0x4df   : > { %3003 = vst [vmem:[%s5234_s28 + $0xf0] sm:$0xff] %v2967_v12  ;;  %v2959_v29 = vadd.f32 %v5230_v39, %v2958_v18 }
 0x4e0   : > { %v3854_v24 = vpop.f32.mrf.mxu1 }
 0x4e1   : > { %3001 = vst [vmem:[%s5234_s28 + $0xe0] sm:$0xff] %v2959_v29  ;;  %v2970_v51 = vadd.f32 %v3854_v24, %v5230_v39 }
 0x4e2   : > { %v2961_v23 = vpop.f32.mrf.mxu1 }
 0x4e3   : > { %3004 = vst [vmem:[%s5234_s28 + $0xf8] sm:$0xff] %v2970_v51  ;;  %v2962_v60 = vadd.f32 %v5230_v39, %v2961_v23 }
 0x4e5   : > { %3002 = vst [vmem:[%s5234_s28 + $0xe8] sm:$0xff] %v2962_v60 }
 0x4e6   : > { %4053 = shalt.err (!%p4050_p9)
}
 0x4e7   : > { %s4054_s30 = scalar_lea.hbm %s5303_s20, 4096  ;;  %s4058_s28 = scalar_lea.hbm %s5367_s15, 8192 }
 0x4e8   : > { %p4055_p10 = scmp.ne.s32.totalorder %s5303_s20, %s4054_s30  ;;  %p4059_p13 = scmp.lt.s32.totalorder %s5303_s20, %s5367_s15 }
 0x4e9   : > { %p4060_p0 = scmp.lt.s32.totalorder %s4058_s28, %s4054_s30 }
 0x4ea   : > { %p4056_p11 = pnand %p4055_p10, %p4243_p5 }
 0x4eb   : > { %p4061_p1 = por %p4060_p0, %p4059_p13 }
 0x4ec   : > { %p4057_p12 = pneg %p4056_p11 }
 0x4ee   : > { %p4062_p2 = pnand %p4061_p1, %p4057_p12 }
 0x4f0   : > { %4065 = shalt.err (!%p4062_p2)
}
 0x4f1   : > { %3871 = dma.vmem_to_hbm [thread:$0]  (%p4243_p5), %s5305_s29, 4096, %s5303_s20, %s3006_s21, %s4109_s2, %s4109_s2, %s4110_s19  }
 0x4f2 PF: > { %s5450_s24 = sld [smem:[#allocation9_spill]]  ;;  %p3887_p3 = scmp.ge.s32.totalorder %s4104_s27, 2 }
 0x4f4   : > { %p3878_p4 = pnand %p3887_p3, %p4247_p6 }
 0x4f6   : > { %p3879_p7 = pneg %p3878_p4 }
 0x4f8   : > { %s3076_s4 = sand.u32 1, %s5450_s24  }
 0x4f9   : > { %s3077_s3 = scalar_lea.sflag [#allocation3], %s3076_s4 }
 0x4fa   : > { %4083 = dma.done.wait (%p3879_p7), %s3077_s3, 4096  }
 0x4fb   : > { %4085 = vsyncadd (%p3879_p7), %s3077_s3, 4294963200  ;;  %s5452_s1 = sadd.s32 4294967294, %s4104_s27  }
 0x4fc   : > { %s3085_s23 = sand.u32 1, %s5452_s1  }
 0x4fd   : > { %s3086_s30 = scalar_lea.sflag [#allocation5], %s3085_s23 }
 0x4fe   : > { %4087 = dma.done.wait (%p3879_p7), %s3086_s30, 8192  }
 0x4ff   : > { %4089 = vsyncadd (%p3879_p7), %s3086_s30, 4294959104  ;;  %s5453_s27 = sld [smem:[#allocation11_spill]]  ;;  %s5456_s24 = smov %s4096_s25 }
 0x500   : > { %s5454_s2 = sld [smem:[#allocation10_spill]] }
 0x501   : > { %s5455_s26 = sld [smem:[#allocation12_spill]] }
 0x505   : > { %p31_p5 = scmp.ge.s32.totalorder %s5453_s27, 4  }
 0x506   : > { %s5457_s25 = smov %s5454_s2 }
 0x507   :  { %33 = sbr.rel (!%p31_p5) target bundleno = 12 (0xc), region = 150 }
 0x50c   :  { %3100 = vsyncpa [#allocation3], 1 }
 0x50d   :  { %3102 = vsyncpa [#allocation3 + $0x1], 1 }
 0x50e   :  { %3103 = vsyncpa [#allocation5], 1 }
 0x50f   :  { %3105 = vsyncpa [#allocation5 + $0x1], 1 }

</bundles_post_ra>
